<compile_context>
chip_gen: v7x
topology: tpu7x:2x2x1
jax: 0.10.0
libtpu: 0.0.40
codegen_flags: <defaults>
</compile_context>

<pallas_src>
import functools
import math

import jax
import jax.numpy as jnp
from jax.experimental import pallas as pl
from jax.experimental.pallas import tpu as pltpu

# ----------------------------- model config ---------------------------------
D_MODEL = 32
NHEAD = 4
NUM_LAYERS = 2
DIM_FF = 64
SEQ = 8
BATCH = 2
NUM_NODES = 144
LN_EPS = 1e-5


# --------------------- fused Pallas kernel (whole forward) ------------------
def fused_transformer_kernel(x_ref, pe_ref, mask_ref, pool_ref,
                             wqkv_ref, bqkv_ref, wo_ref, bo_ref,
                             g1_ref, be1_ref, w1_ref, b1_ref,
                             w2_ref, b2_ref, g2_ref, be2_ref,
                             wh_ref, bh_ref, o_ref, *, nhead, num_layers):
    """Entire forward pass for the whole batch in one kernel launch.

    x_ref:    (B*S, D)        activations, flattened over (batch, seq), f32
    pe_ref:   (B*S, D)        positional encoding tiled over the batch, f32
    mask_ref: (H*B*S, B*S)    block-diag mask (0 inside an element, -1e30 out),
                              tiled over heads for the batched softmax, f32
    pool_ref: (B, B*S)        mean-pool matrix (1/S in each element block), f32
    wqkv:     (L, D, 3D) bf16 fused [Wq|Wk|Wv];  bqkv: (L, 1, 3D) f32
    wo:       (L, D, D)  bf16 unsplit MHA output proj;  bo: (L, 1, D) f32
    w1:       (L, D, F)  bf16;  w2: (L, F, D) bf16;  b1: (L,1,F), b2: (L,1,D) f32
    g1/be1/g2/be2: (L, 1, D) f32 LayerNorm params
    wh: (1, D) f32 output-head row;  bh: (1, 1) f32
    """
    D = wo_ref.shape[-1]
    BS = x_ref.shape[0]
    hd = D // nhead
    scale = 1.0 / math.sqrt(hd)

    # Fused positional-encoding add; activations stay VMEM/vreg-resident.
    x = x_ref[...].astype(jnp.float32) + pe_ref[...]          # (BS, D) f32
    neg_mask = mask_ref[...]                                  # (H*BS, BS) f32

    for l in range(num_layers):                               # static unroll
        # ---------- fused QKV projection (bf16 in, f32 accumulate) ----------
        xb = x.astype(jnp.bfloat16)
        qkv = jnp.dot(xb, wqkv_ref[l],
                      preferred_element_type=jnp.float32) + bqkv_ref[l]   # (BS, 3D) f32
        qkv_b = qkv.astype(jnp.bfloat16)

        # ---------- per-head scores, stacked for ONE batched softmax --------
        s_tiles = []
        for h in range(nhead):                                # static unroll
            qh = qkv_b[:, h * hd:(h + 1) * hd]                # (BS, hd)
            kh = qkv_b[:, D + h * hd:D + (h + 1) * hd]        # (BS, hd)
            # contract last dims of both (A @ B^T without a transpose)
            s_tiles.append(jax.lax.dot_general(
                qh, kh, (((1,), (1,)), ((), ())),
                preferred_element_type=jnp.float32))          # (BS, BS) f32
        s_all = jnp.concatenate(s_tiles, axis=0) * scale + neg_mask   # (H*BS, BS)
        s_all = s_all - jnp.max(s_all, axis=-1, keepdims=True)        # f32, stable
        p_all = jnp.exp(s_all)
        p_all = p_all * pl.reciprocal(jnp.sum(p_all, axis=-1, keepdims=True),
                                      approx=True)
        p_b = p_all.astype(jnp.bfloat16)

        # ---------- per-head context, fused output projection ---------------
        ctx_tiles = []
        for h in range(nhead):
            ph = p_b[h * BS:(h + 1) * BS, :]                  # (BS, BS) bf16
            vh = qkv_b[:, 2 * D + h * hd:2 * D + (h + 1) * hd]  # (BS, hd) bf16
            ctx_tiles.append(jnp.dot(ph, vh,
                                     preferred_element_type=jnp.float32))
        ctx = jnp.concatenate(ctx_tiles, axis=1).astype(jnp.bfloat16)  # (BS, D)
        attn = jnp.dot(ctx, wo_ref[l],
                       preferred_element_type=jnp.float32) + bo_ref[l]

        # ---------- residual + LayerNorm1 (f32) ------------------------------
        x1 = x + attn
        mu1 = jnp.mean(x1, axis=-1, keepdims=True)
        var1 = jnp.mean((x1 - mu1) ** 2, axis=-1, keepdims=True)
        x1 = (x1 - mu1) * jax.lax.rsqrt(var1 + LN_EPS) * g1_ref[l] + be1_ref[l]

        # ---------- feed-forward (relu), bf16 MXU operands -------------------
        h1 = jnp.dot(x1.astype(jnp.bfloat16), w1_ref[l],
                     preferred_element_type=jnp.float32) + b1_ref[l]
        h1 = jnp.maximum(h1, 0.0)
        h2 = jnp.dot(h1.astype(jnp.bfloat16), w2_ref[l],
                     preferred_element_type=jnp.float32) + b2_ref[l]

        # ---------- residual + LayerNorm2 (f32) ------------------------------
        x2 = x1 + h2
        mu2 = jnp.mean(x2, axis=-1, keepdims=True)
        var2 = jnp.mean((x2 - mu2) ** 2, axis=-1, keepdims=True)
        x = (x2 - mu2) * jax.lax.rsqrt(var2 + LN_EPS) * g2_ref[l] + be2_ref[l]

    # ---- mean over seq (tiny f32 pool matmul) + output head on VPU/XLU ------
    pooled = jnp.dot(pool_ref[...], x, preferred_element_type=jnp.float32)  # (B, D)
    y = jnp.sum(pooled * wh_ref[...], axis=-1, keepdims=True) + bh_ref[...]  # (B, 1)
    o_ref[...] = y.astype(o_ref.dtype)


def temporal_transformer(x, params, consts, *, nhead=NHEAD, num_layers=NUM_LAYERS,
                         num_nodes=NUM_NODES):
    B, S, D = x.shape
    x2d = x.reshape(B * S, D)                 # contiguous reshape: free in XLA
    operands = (x2d, consts["pe2d"], consts["mask"], consts["pool"],
                params["wqkv"], params["bqkv"], params["wo"], params["bo"],
                params["g1"], params["be1"], params["w1"], params["b1"],
                params["w2"], params["b2"], params["g2"], params["be2"],
                params["wh"], params["bh"])
    vmem_spec = pl.BlockSpec(memory_space=pltpu.MemorySpace.VMEM)
    y = pl.pallas_call(
        functools.partial(fused_transformer_kernel, nhead=nhead,
                          num_layers=num_layers),
        out_shape=jax.ShapeDtypeStruct((B, 1), jnp.float32),
        in_specs=[vmem_spec] * len(operands),
        out_specs=vmem_spec,
        compiler_params=pltpu.CompilerParams(vmem_limit_bytes=32 * 1024 * 1024),
    )(*operands)
    # unsqueeze(1).repeat(1, num_nodes, 1) -> (B, num_nodes, 1); kept in XLA.
    return jnp.broadcast_to(y[:, None, :], (B, num_nodes, 1))


# ------------------------------ constants / params --------------------------
def positional_encoding(seq_len, d_model):
    position = jnp.arange(seq_len, dtype=jnp.float32)[:, None]
    div_term = jnp.exp(jnp.arange(0, d_model, 2, dtype=jnp.float32)
                       * (-math.log(10000.0) / d_model))
    pe = jnp.zeros((seq_len, d_model), dtype=jnp.float32)
    pe = pe.at[:, 0::2].set(jnp.sin(position * div_term))
    pe = pe.at[:, 1::2].set(jnp.cos(position * div_term))
    return pe


def make_constants(batch, seq, d_model, nhead):
    """Hoisted once: PE table, head-tiled block-diag attention mask, pool matrix."""
    pe2d = jnp.tile(positional_encoding(seq, d_model), (batch, 1))      # (B*S, D)
    bs = batch * seq
    bid = jnp.arange(bs, dtype=jnp.int32) // seq                        # batch id per row
    mask = jnp.where(bid[:, None] == bid[None, :], 0.0, -1e30).astype(jnp.float32)
    mask_h = jnp.tile(mask, (nhead, 1))                                 # (H*B*S, B*S)
    pool = jnp.where(bid[None, :] == jnp.arange(batch, dtype=jnp.int32)[:, None],
                     1.0 / seq, 0.0).astype(jnp.float32)                # (B, B*S)
    return {"pe2d": pe2d, "mask": mask_h, "pool": pool}


def init_params(key, d_model, nhead, num_layers, dim_ff):
    """PyTorch-layout parameters (weights already transposed to x @ W_t form)."""
    layers = []
    for _ in range(num_layers):
        key, *ks = jax.random.split(key, 17)
        p = {
            "wq_t": 0.05 * jax.random.normal(ks[0], (d_model, d_model), jnp.float32),
            "wk_t": 0.05 * jax.random.normal(ks[1], (d_model, d_model), jnp.float32),
            "wv_t": 0.05 * jax.random.normal(ks[2], (d_model, d_model), jnp.float32),
            "bq": 0.01 * jax.random.normal(ks[3], (1, d_model), jnp.float32),
            "bk": 0.01 * jax.random.normal(ks[4], (1, d_model), jnp.float32),
            "bv": 0.01 * jax.random.normal(ks[5], (1, d_model), jnp.float32),
            "wo_t": 0.05 * jax.random.normal(ks[6], (d_model, d_model), jnp.float32),
            "bo": 0.01 * jax.random.normal(ks[7], (1, d_model), jnp.float32),
            "g1": 1.0 + 0.05 * jax.random.normal(ks[8], (1, d_model), jnp.float32),
            "be1": 0.01 * jax.random.normal(ks[9], (1, d_model), jnp.float32),
            "w1_t": 0.05 * jax.random.normal(ks[10], (d_model, dim_ff), jnp.float32),
            "b1": 0.01 * jax.random.normal(ks[11], (1, dim_ff), jnp.float32),
            "w2_t": 0.05 * jax.random.normal(ks[12], (dim_ff, d_model), jnp.float32),
            "b2": 0.01 * jax.random.normal(ks[13], (1, d_model), jnp.float32),
            "g2": 1.0 + 0.05 * jax.random.normal(ks[14], (1, d_model), jnp.float32),
            "be2": 0.01 * jax.random.normal(ks[15], (1, d_model), jnp.float32),
        }
        layers.append(p)
    key, k1, k2 = jax.random.split(key, 3)
    head = {
        "w_head_t": 0.05 * jax.random.normal(k1, (d_model, 1), jnp.float32),
        "b_head": 0.01 * jax.random.normal(k2, (1, 1), jnp.float32),
    }
    return layers, head


def prepare_kernel_params(layer_params, head_params):
    """Refold to lane-dense kernel layouts: fused QKV, unsplit W_o, bf16 MXU weights."""
    f32, bf16 = jnp.float32, jnp.bfloat16
    wqkv = jnp.stack([jnp.concatenate([p["wq_t"], p["wk_t"], p["wv_t"]], axis=1)
                      for p in layer_params]).astype(bf16)               # (L, D, 3D)
    bqkv = jnp.stack([jnp.concatenate([p["bq"], p["bk"], p["bv"]], axis=1)
                      for p in layer_params]).astype(f32)                # (L, 1, 3D)
    stack = lambda name, dt: jnp.stack([p[name] for p in layer_params]).astype(dt)
    return {
        "wqkv": wqkv, "bqkv": bqkv,
        "wo": stack("wo_t", bf16), "bo": stack("bo", f32),
        "g1": stack("g1", f32), "be1": stack("be1", f32),
        "w1": stack("w1_t", bf16), "b1": stack("b1", f32),
        "w2": stack("w2_t", bf16), "b2": stack("b2", f32),
        "g2": stack("g2", f32), "be2": stack("be2", f32),
        "wh": head_params["w_head_t"].T.astype(f32),      # (1, D) row for VPU head
        "bh": head_params["b_head"].astype(f32),          # (1, 1)
    }


# ------------------------- pure-JAX reference (for checking) -----------------
def _layer_norm(x, g, b, eps=LN_EPS):
    mu = jnp.mean(x, axis=-1, keepdims=True)
    var = jnp.mean((x - mu) ** 2, axis=-1, keepdims=True)
    return (x - mu) * jax.lax.rsqrt(var + eps) * g + b


def reference_forward(x, layer_params, head_params, *, nhead, num_nodes):
    B, S, D = x.shape
    hd = D // nhead
    h = x + positional_encoding(S, D)[None, :, :]
    for p in layer_params:
        q = h @ p["wq_t"] + p["bq"]
        k = h @ p["wk_t"] + p["bk"]
        v = h @ p["wv_t"] + p["bv"]
        qh = q.reshape(B, S, nhead, hd).transpose(0, 2, 1, 3)
        kh = k.reshape(B, S, nhead, hd).transpose(0, 2, 1, 3)
        vh = v.reshape(B, S, nhead, hd).transpose(0, 2, 1, 3)
        s = jnp.einsum("bhqd,bhkd->bhqk", qh, kh) / math.sqrt(hd)
        a = jax.nn.softmax(s, axis=-1)
        ctx = jnp.einsum("bhqk,bhkd->bhqd", a, vh).transpose(0, 2, 1, 3).reshape(B, S, D)
        attn = ctx @ p["wo_t"] + p["bo"]
        x1 = _layer_norm(h + attn, p["g1"], p["be1"])
        ff = jnp.maximum(x1 @ p["w1_t"] + p["b1"], 0.0) @ p["w2_t"] + p["b2"]
        h = _layer_norm(x1 + ff, p["g2"], p["be2"])
    pooled = h.mean(axis=1)
    y = pooled @ head_params["w_head_t"] + head_params["b_head"]
    return jnp.broadcast_to(y[:, None, :], (B, num_nodes, 1))


# ---------------------------------- main -------------------------------------
if __name__ == "__main__":
    key = jax.random.PRNGKey(0)
    k_x, k_p = jax.random.split(key)
    x = jax.random.normal(k_x, (BATCH, SEQ, D_MODEL), dtype=jnp.float32)

    layer_params, head_params = init_params(k_p, D_MODEL, NHEAD, NUM_LAYERS, DIM_FF)
    kernel_params = prepare_kernel_params(layer_params, head_params)
    consts = make_constants(BATCH, SEQ, D_MODEL, NHEAD)

    fwd = jax.jit(temporal_transformer)
    out = jax.block_until_ready(fwd(x, kernel_params, consts))

    assert out.shape == (BATCH, NUM_NODES, 1), out.shape
    assert bool(jnp.all(jnp.isfinite(out)))

    # sanity check against a straightforward pure-f32 JAX implementation
    # (tolerance covers bf16 MXU operands + approx reciprocal in the kernel)
    ref = reference_forward(x, layer_params, head_params, nhead=NHEAD, num_nodes=NUM_NODES)
    max_err = float(jnp.max(jnp.abs(out - ref)))
    assert max_err < 3e-2, f"max abs err vs reference: {max_err}"

    print("KERNEL_OK")
</pallas_src>

<mosaic_0001>
module attributes {stable_mosaic.version = 11 : i64} {
  func.func @fused_transformer_kernel(%arg0: memref<16x32xf32, #tpu.memory_space<vmem>>, %arg1: memref<16x32xf32, #tpu.memory_space<vmem>>, %arg2: memref<64x16xf32, #tpu.memory_space<vmem>>, %arg3: memref<2x16xf32, #tpu.memory_space<vmem>>, %arg4: memref<2x32x96xbf16, #tpu.memory_space<vmem>>, %arg5: memref<2x1x96xf32, #tpu.memory_space<vmem>>, %arg6: memref<2x32x32xbf16, #tpu.memory_space<vmem>>, %arg7: memref<2x1x32xf32, #tpu.memory_space<vmem>>, %arg8: memref<2x1x32xf32, #tpu.memory_space<vmem>>, %arg9: memref<2x1x32xf32, #tpu.memory_space<vmem>>, %arg10: memref<2x32x64xbf16, #tpu.memory_space<vmem>>, %arg11: memref<2x1x64xf32, #tpu.memory_space<vmem>>, %arg12: memref<2x64x32xbf16, #tpu.memory_space<vmem>>, %arg13: memref<2x1x32xf32, #tpu.memory_space<vmem>>, %arg14: memref<2x1x32xf32, #tpu.memory_space<vmem>>, %arg15: memref<2x1x32xf32, #tpu.memory_space<vmem>>, %arg16: memref<1x32xf32, #tpu.memory_space<vmem>>, %arg17: memref<1x1xf32, #tpu.memory_space<vmem>>, %arg18: memref<2x1xf32, #tpu.memory_space<vmem>>) attributes {dimension_semantics = [], scalar_prefetch = 0 : i64, scratch_operands = 0 : i64, tpu.core_type = #tpu.core_type<tc>} {
    %c0 = arith.constant 0 : index
    %c0_0 = arith.constant 0 : index
    %0 = vector.load %arg0[%c0, %c0_0] : memref<16x32xf32, #tpu.memory_space<vmem>>, vector<16x32xf32>
    %c0_1 = arith.constant 0 : index
    %c0_2 = arith.constant 0 : index
    %1 = vector.load %arg1[%c0_1, %c0_2] : memref<16x32xf32, #tpu.memory_space<vmem>>, vector<16x32xf32>
    %2 = arith.addf %0, %1 : vector<16x32xf32>
    %c0_3 = arith.constant 0 : index
    %c0_4 = arith.constant 0 : index
    %3 = vector.load %arg2[%c0_3, %c0_4] : memref<64x16xf32, #tpu.memory_space<vmem>>, vector<64x16xf32>
    %4 = arith.truncf %2 : vector<16x32xf32> to vector<16x32xbf16>
    %c0_5 = arith.constant 0 : index
    %c0_6 = arith.constant 0 : index
    %c0_7 = arith.constant 0 : index
    %5 = vector.load %arg4[%c0_5, %c0_6, %c0_7] : memref<2x32x96xbf16, #tpu.memory_space<vmem>>, vector<1x32x96xbf16>
    %6 = vector.shape_cast %5 : vector<1x32x96xbf16> to vector<32x96xbf16>
    %cst = arith.constant dense<0.000000e+00> : vector<16x96xf32>
    %7 = tpu.matmul %4, %6, %cst {dimension_numbers = #tpu.dot_dimension_numbers<[1], [0], [0], [1], [0, 0, 1, 1], [], []>} : vector<16x32xbf16>, vector<32x96xbf16>, vector<16x96xf32> -> vector<16x96xf32>
    %c0_8 = arith.constant 0 : index
    %c0_9 = arith.constant 0 : index
    %c0_10 = arith.constant 0 : index
    %8 = vector.load %arg5[%c0_8, %c0_9, %c0_10] : memref<2x1x96xf32, #tpu.memory_space<vmem>>, vector<1x1x96xf32>
    %9 = vector.shape_cast %8 : vector<1x1x96xf32> to vector<1x96xf32>
    %10 = vector.broadcast %9 : vector<1x96xf32> to vector<16x96xf32>
    %11 = arith.addf %7, %10 : vector<16x96xf32>
    %12 = arith.truncf %11 : vector<16x96xf32> to vector<16x96xbf16>
    %13 = vector.extract_strided_slice %12 {offsets = [0, 0], sizes = [16, 8], strides = [1, 1]} : vector<16x96xbf16> to vector<16x8xbf16>
    %14 = vector.extract_strided_slice %12 {offsets = [0, 32], sizes = [16, 8], strides = [1, 1]} : vector<16x96xbf16> to vector<16x8xbf16>
    %cst_11 = arith.constant dense<0.000000e+00> : vector<16x16xf32>
    %15 = tpu.matmul %13, %14, %cst_11 {dimension_numbers = #tpu.dot_dimension_numbers<[1], [1], [0], [0], [0, 0, 1, 0], [], []>} : vector<16x8xbf16>, vector<16x8xbf16>, vector<16x16xf32> -> vector<16x16xf32>
    %16 = vector.extract_strided_slice %12 {offsets = [0, 8], sizes = [16, 8], strides = [1, 1]} : vector<16x96xbf16> to vector<16x8xbf16>
    %17 = vector.extract_strided_slice %12 {offsets = [0, 40], sizes = [16, 8], strides = [1, 1]} : vector<16x96xbf16> to vector<16x8xbf16>
    %cst_12 = arith.constant dense<0.000000e+00> : vector<16x16xf32>
    %18 = tpu.matmul %16, %17, %cst_12 {dimension_numbers = #tpu.dot_dimension_numbers<[1], [1], [0], [0], [0, 0, 1, 0], [], []>} : vector<16x8xbf16>, vector<16x8xbf16>, vector<16x16xf32> -> vector<16x16xf32>
    %19 = vector.extract_strided_slice %12 {offsets = [0, 16], sizes = [16, 8], strides = [1, 1]} : vector<16x96xbf16> to vector<16x8xbf16>
    %20 = vector.extract_strided_slice %12 {offsets = [0, 48], sizes = [16, 8], strides = [1, 1]} : vector<16x96xbf16> to vector<16x8xbf16>
    %cst_13 = arith.constant dense<0.000000e+00> : vector<16x16xf32>
    %21 = tpu.matmul %19, %20, %cst_13 {dimension_numbers = #tpu.dot_dimension_numbers<[1], [1], [0], [0], [0, 0, 1, 0], [], []>} : vector<16x8xbf16>, vector<16x8xbf16>, vector<16x16xf32> -> vector<16x16xf32>
    %22 = vector.extract_strided_slice %12 {offsets = [0, 24], sizes = [16, 8], strides = [1, 1]} : vector<16x96xbf16> to vector<16x8xbf16>
    %23 = vector.extract_strided_slice %12 {offsets = [0, 56], sizes = [16, 8], strides = [1, 1]} : vector<16x96xbf16> to vector<16x8xbf16>
    %cst_14 = arith.constant dense<0.000000e+00> : vector<16x16xf32>
    %24 = tpu.matmul %22, %23, %cst_14 {dimension_numbers = #tpu.dot_dimension_numbers<[1], [1], [0], [0], [0, 0, 1, 0], [], []>} : vector<16x8xbf16>, vector<16x8xbf16>, vector<16x16xf32> -> vector<16x16xf32>
    %25 = tpu.concatenate %15, %18, %21, %24 in 0 : vector<16x16xf32>, vector<16x16xf32>, vector<16x16xf32>, vector<16x16xf32> -> vector<64x16xf32>
    %cst_15 = arith.constant 0.353553385 : f32
    %26 = vector.broadcast %cst_15 : f32 to vector<64x16xf32>
    %27 = arith.mulf %25, %26 : vector<64x16xf32>
    %28 = arith.addf %27, %3 : vector<64x16xf32>
    %cst_16 = arith.constant dense<0xFF800000> : vector<64xf32>
    %29 = vector.multi_reduction <maximumf>, %28, %cst_16 [1] : vector<64x16xf32> to vector<64xf32>
    %30 = vector.shape_cast %29 : vector<64xf32> to vector<64x1xf32>
    %31 = vector.broadcast %30 : vector<64x1xf32> to vector<64x16xf32>
    %32 = arith.subf %28, %31 : vector<64x16xf32>
    %33 = math.exp %32 : vector<64x16xf32>
    %cst_17 = arith.constant dense<0.000000e+00> : vector<64xf32>
    %34 = vector.multi_reduction <add>, %33, %cst_17 [1] : vector<64x16xf32> to vector<64xf32>
    %35 = vector.shape_cast %34 : vector<64xf32> to vector<64x1xf32>
    %36 = tpu.reciprocal %35 {approx = true} : vector<64x1xf32> -> vector<64x1xf32>
    %37 = vector.broadcast %36 : vector<64x1xf32> to vector<64x16xf32>
    %38 = arith.mulf %33, %37 : vector<64x16xf32>
    %39 = arith.truncf %38 : vector<64x16xf32> to vector<64x16xbf16>
    %40 = vector.extract_strided_slice %39 {offsets = [0, 0], sizes = [16, 16], strides = [1, 1]} : vector<64x16xbf16> to vector<16x16xbf16>
    %41 = vector.extract_strided_slice %12 {offsets = [0, 64], sizes = [16, 8], strides = [1, 1]} : vector<16x96xbf16> to vector<16x8xbf16>
    %cst_18 = arith.constant dense<0.000000e+00> : vector<16x8xf32>
    %42 = tpu.matmul %40, %41, %cst_18 {dimension_numbers = #tpu.dot_dimension_numbers<[1], [0], [0], [1], [0, 0, 1, 1], [], []>} : vector<16x16xbf16>, vector<16x8xbf16>, vector<16x8xf32> -> vector<16x8xf32>
    %43 = vector.extract_strided_slice %39 {offsets = [16, 0], sizes = [16, 16], strides = [1, 1]} : vector<64x16xbf16> to vector<16x16xbf16>
    %44 = vector.extract_strided_slice %12 {offsets = [0, 72], sizes = [16, 8], strides = [1, 1]} : vector<16x96xbf16> to vector<16x8xbf16>
    %cst_19 = arith.constant dense<0.000000e+00> : vector<16x8xf32>
    %45 = tpu.matmul %43, %44, %cst_19 {dimension_numbers = #tpu.dot_dimension_numbers<[1], [0], [0], [1], [0, 0, 1, 1], [], []>} : vector<16x16xbf16>, vector<16x8xbf16>, vector<16x8xf32> -> vector<16x8xf32>
    %46 = vector.extract_strided_slice %39 {offsets = [32, 0], sizes = [16, 16], strides = [1, 1]} : vector<64x16xbf16> to vector<16x16xbf16>
    %47 = vector.extract_strided_slice %12 {offsets = [0, 80], sizes = [16, 8], strides = [1, 1]} : vector<16x96xbf16> to vector<16x8xbf16>
    %cst_20 = arith.constant dense<0.000000e+00> : vector<16x8xf32>
    %48 = tpu.matmul %46, %47, %cst_20 {dimension_numbers = #tpu.dot_dimension_numbers<[1], [0], [0], [1], [0, 0, 1, 1], [], []>} : vector<16x16xbf16>, vector<16x8xbf16>, vector<16x8xf32> -> vector<16x8xf32>
    %49 = vector.extract_strided_slice %39 {offsets = [48, 0], sizes = [16, 16], strides = [1, 1]} : vector<64x16xbf16> to vector<16x16xbf16>
    %50 = vector.extract_strided_slice %12 {offsets = [0, 88], sizes = [16, 8], strides = [1, 1]} : vector<16x96xbf16> to vector<16x8xbf16>
    %cst_21 = arith.constant dense<0.000000e+00> : vector<16x8xf32>
    %51 = tpu.matmul %49, %50, %cst_21 {dimension_numbers = #tpu.dot_dimension_numbers<[1], [0], [0], [1], [0, 0, 1, 1], [], []>} : vector<16x16xbf16>, vector<16x8xbf16>, vector<16x8xf32> -> vector<16x8xf32>
    %52 = tpu.concatenate %42, %45, %48, %51 in 1 : vector<16x8xf32>, vector<16x8xf32>, vector<16x8xf32>, vector<16x8xf32> -> vector<16x32xf32>
    %53 = arith.truncf %52 : vector<16x32xf32> to vector<16x32xbf16>
    %c0_22 = arith.constant 0 : index
    %c0_23 = arith.constant 0 : index
    %c0_24 = arith.constant 0 : index
    %54 = vector.load %arg6[%c0_22, %c0_23, %c0_24] : memref<2x32x32xbf16, #tpu.memory_space<vmem>>, vector<1x32x32xbf16>
    %55 = vector.shape_cast %54 : vector<1x32x32xbf16> to vector<32x32xbf16>
    %cst_25 = arith.constant dense<0.000000e+00> : vector<16x32xf32>
    %56 = tpu.matmul %53, %55, %cst_25 {dimension_numbers = #tpu.dot_dimension_numbers<[1], [0], [0], [1], [0, 0, 1, 1], [], []>} : vector<16x32xbf16>, vector<32x32xbf16>, vector<16x32xf32> -> vector<16x32xf32>
    %c0_26 = arith.constant 0 : index
    %c0_27 = arith.constant 0 : index
    %c0_28 = arith.constant 0 : index
    %57 = vector.load %arg7[%c0_26, %c0_27, %c0_28] : memref<2x1x32xf32, #tpu.memory_space<vmem>>, vector<1x1x32xf32>
    %58 = vector.shape_cast %57 : vector<1x1x32xf32> to vector<1x32xf32>
    %59 = vector.broadcast %58 : vector<1x32xf32> to vector<16x32xf32>
    %60 = arith.addf %56, %59 : vector<16x32xf32>
    %61 = arith.addf %2, %60 : vector<16x32xf32>
    %cst_29 = arith.constant dense<0.000000e+00> : vector<16xf32>
    %62 = vector.multi_reduction <add>, %61, %cst_29 [1] : vector<16x32xf32> to vector<16xf32>
    %63 = vector.shape_cast %62 : vector<16xf32> to vector<16x1xf32>
    %cst_30 = arith.constant 3.200000e+01 : f32
    %64 = vector.broadcast %cst_30 : f32 to vector<16x1xf32>
    %65 = arith.divf %63, %64 : vector<16x1xf32>
    %66 = vector.broadcast %65 : vector<16x1xf32> to vector<16x32xf32>
    %67 = arith.subf %61, %66 : vector<16x32xf32>
    %68 = arith.mulf %67, %67 : vector<16x32xf32>
    %cst_31 = arith.constant dense<0.000000e+00> : vector<16xf32>
    %69 = vector.multi_reduction <add>, %68, %cst_31 [1] : vector<16x32xf32> to vector<16xf32>
    %70 = vector.shape_cast %69 : vector<16xf32> to vector<16x1xf32>
    %cst_32 = arith.constant 3.200000e+01 : f32
    %71 = vector.broadcast %cst_32 : f32 to vector<16x1xf32>
    %72 = arith.divf %70, %71 : vector<16x1xf32>
    %73 = vector.broadcast %65 : vector<16x1xf32> to vector<16x32xf32>
    %74 = arith.subf %61, %73 : vector<16x32xf32>
    %cst_33 = arith.constant 9.99999974E-6 : f32
    %75 = vector.broadcast %cst_33 : f32 to vector<16x1xf32>
    %76 = arith.addf %72, %75 : vector<16x1xf32>
    %77 = math.rsqrt %76 : vector<16x1xf32>
    %78 = vector.broadcast %77 : vector<16x1xf32> to vector<16x32xf32>
    %79 = arith.mulf %74, %78 : vector<16x32xf32>
    %c0_34 = arith.constant 0 : index
    %c0_35 = arith.constant 0 : index
    %c0_36 = arith.constant 0 : index
    %80 = vector.load %arg8[%c0_34, %c0_35, %c0_36] : memref<2x1x32xf32, #tpu.memory_space<vmem>>, vector<1x1x32xf32>
    %81 = vector.shape_cast %80 : vector<1x1x32xf32> to vector<1x32xf32>
    %82 = vector.broadcast %81 : vector<1x32xf32> to vector<16x32xf32>
    %83 = arith.mulf %79, %82 : vector<16x32xf32>
    %c0_37 = arith.constant 0 : index
    %c0_38 = arith.constant 0 : index
    %c0_39 = arith.constant 0 : index
    %84 = vector.load %arg9[%c0_37, %c0_38, %c0_39] : memref<2x1x32xf32, #tpu.memory_space<vmem>>, vector<1x1x32xf32>
    %85 = vector.shape_cast %84 : vector<1x1x32xf32> to vector<1x32xf32>
    %86 = vector.broadcast %85 : vector<1x32xf32> to vector<16x32xf32>
    %87 = arith.addf %83, %86 : vector<16x32xf32>
    %88 = arith.truncf %87 : vector<16x32xf32> to vector<16x32xbf16>
    %c0_40 = arith.constant 0 : index
    %c0_41 = arith.constant 0 : index
    %c0_42 = arith.constant 0 : index
    %89 = vector.load %arg10[%c0_40, %c0_41, %c0_42] : memref<2x32x64xbf16, #tpu.memory_space<vmem>>, vector<1x32x64xbf16>
    %90 = vector.shape_cast %89 : vector<1x32x64xbf16> to vector<32x64xbf16>
    %cst_43 = arith.constant dense<0.000000e+00> : vector<16x64xf32>
    %91 = tpu.matmul %88, %90, %cst_43 {dimension_numbers = #tpu.dot_dimension_numbers<[1], [0], [0], [1], [0, 0, 1, 1], [], []>} : vector<16x32xbf16>, vector<32x64xbf16>, vector<16x64xf32> -> vector<16x64xf32>
    %c0_44 = arith.constant 0 : index
    %c0_45 = arith.constant 0 : index
    %c0_46 = arith.constant 0 : index
    %92 = vector.load %arg11[%c0_44, %c0_45, %c0_46] : memref<2x1x64xf32, #tpu.memory_space<vmem>>, vector<1x1x64xf32>
    %93 = vector.shape_cast %92 : vector<1x1x64xf32> to vector<1x64xf32>
    %94 = vector.broadcast %93 : vector<1x64xf32> to vector<16x64xf32>
    %95 = arith.addf %91, %94 : vector<16x64xf32>
    %cst_47 = arith.constant 0.000000e+00 : f32
    %96 = vector.broadcast %cst_47 : f32 to vector<16x64xf32>
    %97 = arith.maximumf %95, %96 : vector<16x64xf32>
    %98 = arith.truncf %97 : vector<16x64xf32> to vector<16x64xbf16>
    %c0_48 = arith.constant 0 : index
    %c0_49 = arith.constant 0 : index
    %c0_50 = arith.constant 0 : index
    %99 = vector.load %arg12[%c0_48, %c0_49, %c0_50] : memref<2x64x32xbf16, #tpu.memory_space<vmem>>, vector<1x64x32xbf16>
    %100 = vector.shape_cast %99 : vector<1x64x32xbf16> to vector<64x32xbf16>
    %cst_51 = arith.constant dense<0.000000e+00> : vector<16x32xf32>
    %101 = tpu.matmul %98, %100, %cst_51 {dimension_numbers = #tpu.dot_dimension_numbers<[1], [0], [0], [1], [0, 0, 1, 1], [], []>} : vector<16x64xbf16>, vector<64x32xbf16>, vector<16x32xf32> -> vector<16x32xf32>
    %c0_52 = arith.constant 0 : index
    %c0_53 = arith.constant 0 : index
    %c0_54 = arith.constant 0 : index
    %102 = vector.load %arg13[%c0_52, %c0_53, %c0_54] : memref<2x1x32xf32, #tpu.memory_space<vmem>>, vector<1x1x32xf32>
    %103 = vector.shape_cast %102 : vector<1x1x32xf32> to vector<1x32xf32>
    %104 = vector.broadcast %103 : vector<1x32xf32> to vector<16x32xf32>
    %105 = arith.addf %101, %104 : vector<16x32xf32>
    %106 = arith.addf %87, %105 : vector<16x32xf32>
    %cst_55 = arith.constant dense<0.000000e+00> : vector<16xf32>
    %107 = vector.multi_reduction <add>, %106, %cst_55 [1] : vector<16x32xf32> to vector<16xf32>
    %108 = vector.shape_cast %107 : vector<16xf32> to vector<16x1xf32>
    %cst_56 = arith.constant 3.200000e+01 : f32
    %109 = vector.broadcast %cst_56 : f32 to vector<16x1xf32>
    %110 = arith.divf %108, %109 : vector<16x1xf32>
    %111 = vector.broadcast %110 : vector<16x1xf32> to vector<16x32xf32>
    %112 = arith.subf %106, %111 : vector<16x32xf32>
    %113 = arith.mulf %112, %112 : vector<16x32xf32>
    %cst_57 = arith.constant dense<0.000000e+00> : vector<16xf32>
    %114 = vector.multi_reduction <add>, %113, %cst_57 [1] : vector<16x32xf32> to vector<16xf32>
    %115 = vector.shape_cast %114 : vector<16xf32> to vector<16x1xf32>
    %cst_58 = arith.constant 3.200000e+01 : f32
    %116 = vector.broadcast %cst_58 : f32 to vector<16x1xf32>
    %117 = arith.divf %115, %116 : vector<16x1xf32>
    %118 = vector.broadcast %110 : vector<16x1xf32> to vector<16x32xf32>
    %119 = arith.subf %106, %118 : vector<16x32xf32>
    %cst_59 = arith.constant 9.99999974E-6 : f32
    %120 = vector.broadcast %cst_59 : f32 to vector<16x1xf32>
    %121 = arith.addf %117, %120 : vector<16x1xf32>
    %122 = math.rsqrt %121 : vector<16x1xf32>
    %123 = vector.broadcast %122 : vector<16x1xf32> to vector<16x32xf32>
    %124 = arith.mulf %119, %123 : vector<16x32xf32>
    %c0_60 = arith.constant 0 : index
    %c0_61 = arith.constant 0 : index
    %c0_62 = arith.constant 0 : index
    %125 = vector.load %arg14[%c0_60, %c0_61, %c0_62] : memref<2x1x32xf32, #tpu.memory_space<vmem>>, vector<1x1x32xf32>
    %126 = vector.shape_cast %125 : vector<1x1x32xf32> to vector<1x32xf32>
    %127 = vector.broadcast %126 : vector<1x32xf32> to vector<16x32xf32>
    %128 = arith.mulf %124, %127 : vector<16x32xf32>
    %c0_63 = arith.constant 0 : index
    %c0_64 = arith.constant 0 : index
    %c0_65 = arith.constant 0 : index
    %129 = vector.load %arg15[%c0_63, %c0_64, %c0_65] : memref<2x1x32xf32, #tpu.memory_space<vmem>>, vector<1x1x32xf32>
    %130 = vector.shape_cast %129 : vector<1x1x32xf32> to vector<1x32xf32>
    %131 = vector.broadcast %130 : vector<1x32xf32> to vector<16x32xf32>
    %132 = arith.addf %128, %131 : vector<16x32xf32>
    %133 = arith.truncf %132 : vector<16x32xf32> to vector<16x32xbf16>
    %c1 = arith.constant 1 : index
    %c0_66 = arith.constant 0 : index
    %c0_67 = arith.constant 0 : index
    %134 = vector.load %arg4[%c1, %c0_66, %c0_67] : memref<2x32x96xbf16, #tpu.memory_space<vmem>>, vector<1x32x96xbf16>
    %135 = vector.shape_cast %134 : vector<1x32x96xbf16> to vector<32x96xbf16>
    %cst_68 = arith.constant dense<0.000000e+00> : vector<16x96xf32>
    %136 = tpu.matmul %133, %135, %cst_68 {dimension_numbers = #tpu.dot_dimension_numbers<[1], [0], [0], [1], [0, 0, 1, 1], [], []>} : vector<16x32xbf16>, vector<32x96xbf16>, vector<16x96xf32> -> vector<16x96xf32>
    %c1_69 = arith.constant 1 : index
    %c0_70 = arith.constant 0 : index
    %c0_71 = arith.constant 0 : index
    %137 = vector.load %arg5[%c1_69, %c0_70, %c0_71] : memref<2x1x96xf32, #tpu.memory_space<vmem>>, vector<1x1x96xf32>
    %138 = vector.shape_cast %137 : vector<1x1x96xf32> to vector<1x96xf32>
    %139 = vector.broadcast %138 : vector<1x96xf32> to vector<16x96xf32>
    %140 = arith.addf %136, %139 : vector<16x96xf32>
    %141 = arith.truncf %140 : vector<16x96xf32> to vector<16x96xbf16>
    %142 = vector.extract_strided_slice %141 {offsets = [0, 0], sizes = [16, 8], strides = [1, 1]} : vector<16x96xbf16> to vector<16x8xbf16>
    %143 = vector.extract_strided_slice %141 {offsets = [0, 32], sizes = [16, 8], strides = [1, 1]} : vector<16x96xbf16> to vector<16x8xbf16>
    %cst_72 = arith.constant dense<0.000000e+00> : vector<16x16xf32>
    %144 = tpu.matmul %142, %143, %cst_72 {dimension_numbers = #tpu.dot_dimension_numbers<[1], [1], [0], [0], [0, 0, 1, 0], [], []>} : vector<16x8xbf16>, vector<16x8xbf16>, vector<16x16xf32> -> vector<16x16xf32>
    %145 = vector.extract_strided_slice %141 {offsets = [0, 8], sizes = [16, 8], strides = [1, 1]} : vector<16x96xbf16> to vector<16x8xbf16>
    %146 = vector.extract_strided_slice %141 {offsets = [0, 40], sizes = [16, 8], strides = [1, 1]} : vector<16x96xbf16> to vector<16x8xbf16>
    %cst_73 = arith.constant dense<0.000000e+00> : vector<16x16xf32>
    %147 = tpu.matmul %145, %146, %cst_73 {dimension_numbers = #tpu.dot_dimension_numbers<[1], [1], [0], [0], [0, 0, 1, 0], [], []>} : vector<16x8xbf16>, vector<16x8xbf16>, vector<16x16xf32> -> vector<16x16xf32>
    %148 = vector.extract_strided_slice %141 {offsets = [0, 16], sizes = [16, 8], strides = [1, 1]} : vector<16x96xbf16> to vector<16x8xbf16>
    %149 = vector.extract_strided_slice %141 {offsets = [0, 48], sizes = [16, 8], strides = [1, 1]} : vector<16x96xbf16> to vector<16x8xbf16>
    %cst_74 = arith.constant dense<0.000000e+00> : vector<16x16xf32>
    %150 = tpu.matmul %148, %149, %cst_74 {dimension_numbers = #tpu.dot_dimension_numbers<[1], [1], [0], [0], [0, 0, 1, 0], [], []>} : vector<16x8xbf16>, vector<16x8xbf16>, vector<16x16xf32> -> vector<16x16xf32>
    %151 = vector.extract_strided_slice %141 {offsets = [0, 24], sizes = [16, 8], strides = [1, 1]} : vector<16x96xbf16> to vector<16x8xbf16>
    %152 = vector.extract_strided_slice %141 {offsets = [0, 56], sizes = [16, 8], strides = [1, 1]} : vector<16x96xbf16> to vector<16x8xbf16>
    %cst_75 = arith.constant dense<0.000000e+00> : vector<16x16xf32>
    %153 = tpu.matmul %151, %152, %cst_75 {dimension_numbers = #tpu.dot_dimension_numbers<[1], [1], [0], [0], [0, 0, 1, 0], [], []>} : vector<16x8xbf16>, vector<16x8xbf16>, vector<16x16xf32> -> vector<16x16xf32>
    %154 = tpu.concatenate %144, %147, %150, %153 in 0 : vector<16x16xf32>, vector<16x16xf32>, vector<16x16xf32>, vector<16x16xf32> -> vector<64x16xf32>
    %cst_76 = arith.constant 0.353553385 : f32
    %155 = vector.broadcast %cst_76 : f32 to vector<64x16xf32>
    %156 = arith.mulf %154, %155 : vector<64x16xf32>
    %157 = arith.addf %156, %3 : vector<64x16xf32>
    %cst_77 = arith.constant dense<0xFF800000> : vector<64xf32>
    %158 = vector.multi_reduction <maximumf>, %157, %cst_77 [1] : vector<64x16xf32> to vector<64xf32>
    %159 = vector.shape_cast %158 : vector<64xf32> to vector<64x1xf32>
    %160 = vector.broadcast %159 : vector<64x1xf32> to vector<64x16xf32>
    %161 = arith.subf %157, %160 : vector<64x16xf32>
    %162 = math.exp %161 : vector<64x16xf32>
    %cst_78 = arith.constant dense<0.000000e+00> : vector<64xf32>
    %163 = vector.multi_reduction <add>, %162, %cst_78 [1] : vector<64x16xf32> to vector<64xf32>
    %164 = vector.shape_cast %163 : vector<64xf32> to vector<64x1xf32>
    %165 = tpu.reciprocal %164 {approx = true} : vector<64x1xf32> -> vector<64x1xf32>
    %166 = vector.broadcast %165 : vector<64x1xf32> to vector<64x16xf32>
    %167 = arith.mulf %162, %166 : vector<64x16xf32>
    %168 = arith.truncf %167 : vector<64x16xf32> to vector<64x16xbf16>
    %169 = vector.extract_strided_slice %168 {offsets = [0, 0], sizes = [16, 16], strides = [1, 1]} : vector<64x16xbf16> to vector<16x16xbf16>
    %170 = vector.extract_strided_slice %141 {offsets = [0, 64], sizes = [16, 8], strides = [1, 1]} : vector<16x96xbf16> to vector<16x8xbf16>
    %cst_79 = arith.constant dense<0.000000e+00> : vector<16x8xf32>
    %171 = tpu.matmul %169, %170, %cst_79 {dimension_numbers = #tpu.dot_dimension_numbers<[1], [0], [0], [1], [0, 0, 1, 1], [], []>} : vector<16x16xbf16>, vector<16x8xbf16>, vector<16x8xf32> -> vector<16x8xf32>
    %172 = vector.extract_strided_slice %168 {offsets = [16, 0], sizes = [16, 16], strides = [1, 1]} : vector<64x16xbf16> to vector<16x16xbf16>
    %173 = vector.extract_strided_slice %141 {offsets = [0, 72], sizes = [16, 8], strides = [1, 1]} : vector<16x96xbf16> to vector<16x8xbf16>
    %cst_80 = arith.constant dense<0.000000e+00> : vector<16x8xf32>
    %174 = tpu.matmul %172, %173, %cst_80 {dimension_numbers = #tpu.dot_dimension_numbers<[1], [0], [0], [1], [0, 0, 1, 1], [], []>} : vector<16x16xbf16>, vector<16x8xbf16>, vector<16x8xf32> -> vector<16x8xf32>
    %175 = vector.extract_strided_slice %168 {offsets = [32, 0], sizes = [16, 16], strides = [1, 1]} : vector<64x16xbf16> to vector<16x16xbf16>
    %176 = vector.extract_strided_slice %141 {offsets = [0, 80], sizes = [16, 8], strides = [1, 1]} : vector<16x96xbf16> to vector<16x8xbf16>
    %cst_81 = arith.constant dense<0.000000e+00> : vector<16x8xf32>
    %177 = tpu.matmul %175, %176, %cst_81 {dimension_numbers = #tpu.dot_dimension_numbers<[1], [0], [0], [1], [0, 0, 1, 1], [], []>} : vector<16x16xbf16>, vector<16x8xbf16>, vector<16x8xf32> -> vector<16x8xf32>
    %178 = vector.extract_strided_slice %168 {offsets = [48, 0], sizes = [16, 16], strides = [1, 1]} : vector<64x16xbf16> to vector<16x16xbf16>
    %179 = vector.extract_strided_slice %141 {offsets = [0, 88], sizes = [16, 8], strides = [1, 1]} : vector<16x96xbf16> to vector<16x8xbf16>
    %cst_82 = arith.constant dense<0.000000e+00> : vector<16x8xf32>
    %180 = tpu.matmul %178, %179, %cst_82 {dimension_numbers = #tpu.dot_dimension_numbers<[1], [0], [0], [1], [0, 0, 1, 1], [], []>} : vector<16x16xbf16>, vector<16x8xbf16>, vector<16x8xf32> -> vector<16x8xf32>
    %181 = tpu.concatenate %171, %174, %177, %180 in 1 : vector<16x8xf32>, vector<16x8xf32>, vector<16x8xf32>, vector<16x8xf32> -> vector<16x32xf32>
    %182 = arith.truncf %181 : vector<16x32xf32> to vector<16x32xbf16>
    %c1_83 = arith.constant 1 : index
    %c0_84 = arith.constant 0 : index
    %c0_85 = arith.constant 0 : index
    %183 = vector.load %arg6[%c1_83, %c0_84, %c0_85] : memref<2x32x32xbf16, #tpu.memory_space<vmem>>, vector<1x32x32xbf16>
    %184 = vector.shape_cast %183 : vector<1x32x32xbf16> to vector<32x32xbf16>
    %cst_86 = arith.constant dense<0.000000e+00> : vector<16x32xf32>
    %185 = tpu.matmul %182, %184, %cst_86 {dimension_numbers = #tpu.dot_dimension_numbers<[1], [0], [0], [1], [0, 0, 1, 1], [], []>} : vector<16x32xbf16>, vector<32x32xbf16>, vector<16x32xf32> -> vector<16x32xf32>
    %c1_87 = arith.constant 1 : index
    %c0_88 = arith.constant 0 : index
    %c0_89 = arith.constant 0 : index
    %186 = vector.load %arg7[%c1_87, %c0_88, %c0_89] : memref<2x1x32xf32, #tpu.memory_space<vmem>>, vector<1x1x32xf32>
    %187 = vector.shape_cast %186 : vector<1x1x32xf32> to vector<1x32xf32>
    %188 = vector.broadcast %187 : vector<1x32xf32> to vector<16x32xf32>
    %189 = arith.addf %185, %188 : vector<16x32xf32>
    %190 = arith.addf %132, %189 : vector<16x32xf32>
    %cst_90 = arith.constant dense<0.000000e+00> : vector<16xf32>
    %191 = vector.multi_reduction <add>, %190, %cst_90 [1] : vector<16x32xf32> to vector<16xf32>
    %192 = vector.shape_cast %191 : vector<16xf32> to vector<16x1xf32>
    %cst_91 = arith.constant 3.200000e+01 : f32
    %193 = vector.broadcast %cst_91 : f32 to vector<16x1xf32>
    %194 = arith.divf %192, %193 : vector<16x1xf32>
    %195 = vector.broadcast %194 : vector<16x1xf32> to vector<16x32xf32>
    %196 = arith.subf %190, %195 : vector<16x32xf32>
    %197 = arith.mulf %196, %196 : vector<16x32xf32>
    %cst_92 = arith.constant dense<0.000000e+00> : vector<16xf32>
    %198 = vector.multi_reduction <add>, %197, %cst_92 [1] : vector<16x32xf32> to vector<16xf32>
    %199 = vector.shape_cast %198 : vector<16xf32> to vector<16x1xf32>
    %cst_93 = arith.constant 3.200000e+01 : f32
    %200 = vector.broadcast %cst_93 : f32 to vector<16x1xf32>
    %201 = arith.divf %199, %200 : vector<16x1xf32>
    %202 = vector.broadcast %194 : vector<16x1xf32> to vector<16x32xf32>
    %203 = arith.subf %190, %202 : vector<16x32xf32>
    %cst_94 = arith.constant 9.99999974E-6 : f32
    %204 = vector.broadcast %cst_94 : f32 to vector<16x1xf32>
    %205 = arith.addf %201, %204 : vector<16x1xf32>
    %206 = math.rsqrt %205 : vector<16x1xf32>
    %207 = vector.broadcast %206 : vector<16x1xf32> to vector<16x32xf32>
    %208 = arith.mulf %203, %207 : vector<16x32xf32>
    %c1_95 = arith.constant 1 : index
    %c0_96 = arith.constant 0 : index
    %c0_97 = arith.constant 0 : index
    %209 = vector.load %arg8[%c1_95, %c0_96, %c0_97] : memref<2x1x32xf32, #tpu.memory_space<vmem>>, vector<1x1x32xf32>
    %210 = vector.shape_cast %209 : vector<1x1x32xf32> to vector<1x32xf32>
    %211 = vector.broadcast %210 : vector<1x32xf32> to vector<16x32xf32>
    %212 = arith.mulf %208, %211 : vector<16x32xf32>
    %c1_98 = arith.constant 1 : index
    %c0_99 = arith.constant 0 : index
    %c0_100 = arith.constant 0 : index
    %213 = vector.load %arg9[%c1_98, %c0_99, %c0_100] : memref<2x1x32xf32, #tpu.memory_space<vmem>>, vector<1x1x32xf32>
    %214 = vector.shape_cast %213 : vector<1x1x32xf32> to vector<1x32xf32>
    %215 = vector.broadcast %214 : vector<1x32xf32> to vector<16x32xf32>
    %216 = arith.addf %212, %215 : vector<16x32xf32>
    %217 = arith.truncf %216 : vector<16x32xf32> to vector<16x32xbf16>
    %c1_101 = arith.constant 1 : index
    %c0_102 = arith.constant 0 : index
    %c0_103 = arith.constant 0 : index
    %218 = vector.load %arg10[%c1_101, %c0_102, %c0_103] : memref<2x32x64xbf16, #tpu.memory_space<vmem>>, vector<1x32x64xbf16>
    %219 = vector.shape_cast %218 : vector<1x32x64xbf16> to vector<32x64xbf16>
    %cst_104 = arith.constant dense<0.000000e+00> : vector<16x64xf32>
    %220 = tpu.matmul %217, %219, %cst_104 {dimension_numbers = #tpu.dot_dimension_numbers<[1], [0], [0], [1], [0, 0, 1, 1], [], []>} : vector<16x32xbf16>, vector<32x64xbf16>, vector<16x64xf32> -> vector<16x64xf32>
    %c1_105 = arith.constant 1 : index
    %c0_106 = arith.constant 0 : index
    %c0_107 = arith.constant 0 : index
    %221 = vector.load %arg11[%c1_105, %c0_106, %c0_107] : memref<2x1x64xf32, #tpu.memory_space<vmem>>, vector<1x1x64xf32>
    %222 = vector.shape_cast %221 : vector<1x1x64xf32> to vector<1x64xf32>
    %223 = vector.broadcast %222 : vector<1x64xf32> to vector<16x64xf32>
    %224 = arith.addf %220, %223 : vector<16x64xf32>
    %cst_108 = arith.constant 0.000000e+00 : f32
    %225 = vector.broadcast %cst_108 : f32 to vector<16x64xf32>
    %226 = arith.maximumf %224, %225 : vector<16x64xf32>
    %227 = arith.truncf %226 : vector<16x64xf32> to vector<16x64xbf16>
    %c1_109 = arith.constant 1 : index
    %c0_110 = arith.constant 0 : index
    %c0_111 = arith.constant 0 : index
    %228 = vector.load %arg12[%c1_109, %c0_110, %c0_111] : memref<2x64x32xbf16, #tpu.memory_space<vmem>>, vector<1x64x32xbf16>
    %229 = vector.shape_cast %228 : vector<1x64x32xbf16> to vector<64x32xbf16>
    %cst_112 = arith.constant dense<0.000000e+00> : vector<16x32xf32>
    %230 = tpu.matmul %227, %229, %cst_112 {dimension_numbers = #tpu.dot_dimension_numbers<[1], [0], [0], [1], [0, 0, 1, 1], [], []>} : vector<16x64xbf16>, vector<64x32xbf16>, vector<16x32xf32> -> vector<16x32xf32>
    %c1_113 = arith.constant 1 : index
    %c0_114 = arith.constant 0 : index
    %c0_115 = arith.constant 0 : index
    %231 = vector.load %arg13[%c1_113, %c0_114, %c0_115] : memref<2x1x32xf32, #tpu.memory_space<vmem>>, vector<1x1x32xf32>
    %232 = vector.shape_cast %231 : vector<1x1x32xf32> to vector<1x32xf32>
    %233 = vector.broadcast %232 : vector<1x32xf32> to vector<16x32xf32>
    %234 = arith.addf %230, %233 : vector<16x32xf32>
    %235 = arith.addf %216, %234 : vector<16x32xf32>
    %cst_116 = arith.constant dense<0.000000e+00> : vector<16xf32>
    %236 = vector.multi_reduction <add>, %235, %cst_116 [1] : vector<16x32xf32> to vector<16xf32>
    %237 = vector.shape_cast %236 : vector<16xf32> to vector<16x1xf32>
    %cst_117 = arith.constant 3.200000e+01 : f32
    %238 = vector.broadcast %cst_117 : f32 to vector<16x1xf32>
    %239 = arith.divf %237, %238 : vector<16x1xf32>
    %240 = vector.broadcast %239 : vector<16x1xf32> to vector<16x32xf32>
    %241 = arith.subf %235, %240 : vector<16x32xf32>
    %242 = arith.mulf %241, %241 : vector<16x32xf32>
    %cst_118 = arith.constant dense<0.000000e+00> : vector<16xf32>
    %243 = vector.multi_reduction <add>, %242, %cst_118 [1] : vector<16x32xf32> to vector<16xf32>
    %244 = vector.shape_cast %243 : vector<16xf32> to vector<16x1xf32>
    %cst_119 = arith.constant 3.200000e+01 : f32
    %245 = vector.broadcast %cst_119 : f32 to vector<16x1xf32>
    %246 = arith.divf %244, %245 : vector<16x1xf32>
    %247 = vector.broadcast %239 : vector<16x1xf32> to vector<16x32xf32>
    %248 = arith.subf %235, %247 : vector<16x32xf32>
    %cst_120 = arith.constant 9.99999974E-6 : f32
    %249 = vector.broadcast %cst_120 : f32 to vector<16x1xf32>
    %250 = arith.addf %246, %249 : vector<16x1xf32>
    %251 = math.rsqrt %250 : vector<16x1xf32>
    %252 = vector.broadcast %251 : vector<16x1xf32> to vector<16x32xf32>
    %253 = arith.mulf %248, %252 : vector<16x32xf32>
    %c1_121 = arith.constant 1 : index
    %c0_122 = arith.constant 0 : index
    %c0_123 = arith.constant 0 : index
    %254 = vector.load %arg14[%c1_121, %c0_122, %c0_123] : memref<2x1x32xf32, #tpu.memory_space<vmem>>, vector<1x1x32xf32>
    %255 = vector.shape_cast %254 : vector<1x1x32xf32> to vector<1x32xf32>
    %256 = vector.broadcast %255 : vector<1x32xf32> to vector<16x32xf32>
    %257 = arith.mulf %253, %256 : vector<16x32xf32>
    %c1_124 = arith.constant 1 : index
    %c0_125 = arith.constant 0 : index
    %c0_126 = arith.constant 0 : index
    %258 = vector.load %arg15[%c1_124, %c0_125, %c0_126] : memref<2x1x32xf32, #tpu.memory_space<vmem>>, vector<1x1x32xf32>
    %259 = vector.shape_cast %258 : vector<1x1x32xf32> to vector<1x32xf32>
    %260 = vector.broadcast %259 : vector<1x32xf32> to vector<16x32xf32>
    %261 = arith.addf %257, %260 : vector<16x32xf32>
    %c0_127 = arith.constant 0 : index
    %c0_128 = arith.constant 0 : index
    %262 = vector.load %arg3[%c0_127, %c0_128] : memref<2x16xf32, #tpu.memory_space<vmem>>, vector<2x16xf32>
    %cst_129 = arith.constant dense<0.000000e+00> : vector<2x32xf32>
    %263 = tpu.matmul %262, %261, %cst_129 {dimension_numbers = #tpu.dot_dimension_numbers<[1], [0], [0], [1], [0, 0, 1, 1], [], []>} : vector<2x16xf32>, vector<16x32xf32>, vector<2x32xf32> -> vector<2x32xf32>
    %c0_130 = arith.constant 0 : index
    %c0_131 = arith.constant 0 : index
    %264 = vector.load %arg16[%c0_130, %c0_131] : memref<1x32xf32, #tpu.memory_space<vmem>>, vector<1x32xf32>
    %265 = vector.broadcast %264 : vector<1x32xf32> to vector<2x32xf32>
    %266 = arith.mulf %263, %265 : vector<2x32xf32>
    %cst_132 = arith.constant dense<0.000000e+00> : vector<2xf32>
    %267 = vector.multi_reduction <add>, %266, %cst_132 [1] : vector<2x32xf32> to vector<2xf32>
    %268 = vector.shape_cast %267 : vector<2xf32> to vector<2x1xf32>
    %c0_133 = arith.constant 0 : index
    %c0_134 = arith.constant 0 : index
    %269 = vector.load %arg17[%c0_133, %c0_134] : memref<1x1xf32, #tpu.memory_space<vmem>>, vector<1x1xf32>
    %270 = vector.broadcast %269 : vector<1x1xf32> to vector<2x1xf32>
    %271 = arith.addf %268, %270 : vector<2x1xf32>
    %c0_135 = arith.constant 0 : index
    %c0_136 = arith.constant 0 : index
    %272 = vector.load %arg18[%c0_135, %c0_136] : memref<2x1xf32, #tpu.memory_space<vmem>>, vector<2x1xf32>
    tpu.vector_store %arg18[%c0_135, %c0_136], %271 {strides = array<i32>} : memref<2x1xf32, #tpu.memory_space<vmem>>, vector<2x1xf32>,
    return
  }
}

</mosaic_0001>

<bundles_post_ra>
// kernel: temporal_transformer.1
= control target key start
LH: loop header
LB: loop body
LE: loop exit
PB: predicated region body
PF: predicated region fallthrough
CT: control target
= control target key end

     0   :  { %v2497_v0 = vmov 0.0   ;;  %vm2498_vm0 = vmmov 0   ;;  %vm100_vm1 = vcmask 261120   ;;  %s2499_s30 = smov 80   ;;  %s2501_s19 = smov 120   ;;  %vm149_vm2 = vcmask 64512   ;;  %s3048_s4 = inlined_call_operand.vmem [shape: bf16[2,32,96], index: 4, kind: input, shape index: {}]   ;;  %s3049_s0 = inlined_call_operand.vmem [shape: f32[16,32], index: 0, kind: input, shape index: {}]   ;;  %s3050_s1 = inlined_call_operand.vmem [shape: f32[16,32], index: 1, kind: input, shape index: {}]   ;;  %s3051_s5 = inlined_call_operand.vmem [shape: f32[2,1,96], index: 5, kind: input, shape index: {}]   ;;  %s3052_s2 = inlined_call_operand.vmem [shape: f32[64,16], index: 2, kind: input, shape index: {}]   ;;  %s3053_s6 = inlined_call_operand.vmem [shape: bf16[2,32,32], index: 6, kind: input, shape index: {}]   ;;  %s3054_s7 = inlined_call_operand.vmem [shape: f32[2,1,32], index: 7, kind: input, shape index: {}]   ;;  %s3055_s10 = inlined_call_operand.vmem [shape: bf16[2,32,64], index: 10, kind: input, shape index: {}]   ;;  %s3056_s12 = inlined_call_operand.vmem [shape: bf16[2,64,32], index: 12, kind: input, shape index: {}]   ;;  %s3057_s8 = inlined_call_operand.vmem [shape: f32[2,1,32], index: 8, kind: input, shape index: {}]   ;;  %s3058_s9 = inlined_call_operand.vmem [shape: f32[2,1,32], index: 9, kind: input, shape index: {}]   ;;  %s3059_s11 = inlined_call_operand.vmem [shape: f32[2,1,64], index: 11, kind: input, shape index: {}]   ;;  %s3060_s13 = inlined_call_operand.vmem [shape: f32[2,1,32], index: 13, kind: input, shape index: {}]   ;;  %s3061_s14 = inlined_call_operand.vmem [shape: f32[2,1,32], index: 14, kind: input, shape index: {}]   ;;  %s3062_s15 = inlined_call_operand.vmem [shape: f32[2,1,32], index: 15, kind: input, shape index: {}]   ;;  %s3063_s3 = inlined_call_operand.vmem [shape: f32[2,16], index: 3, kind: input, shape index: {}]   ;;  %s3064_s17 = inlined_call_operand.<no memory space> [shape: f32[1,1], index: 17, kind: input, shape index: {}]   ;;  %s3065_s16 = inlined_call_operand.vmem [shape: f32[1,32], index: 16, kind: input, shape index: {}]   ;;  %s3066_s18 = inlined_call_operand.vmem [shape: f32[2,1], index: 18, kind: output, shape index: {}]  }
   0x1   :  { %3077 = sst [smem:[#allocation3_spill]] %s3048_s4  ;;  %2172 = vmatprep.subr.bf16.mxu1 %v2497_v0  ;;  %2176 = vmatprep.mubr.msk.bf16.mxu1 %vm2498_vm0, %v2497_v0  ;;  %v2018_v10 = vld [vmem:[%s3051_s5] ss:$0 sm:$0xff]  ;;  %s2500_s4 = smov 96   ;;  %vm366_vm3 = vcmask 130048   ;;  %v2692_v34 = vld [vmem:[%s3052_s2 + $0x8] sm:$0xff] }
   0x2   :  { %3078 = sst [smem:[#allocation4_spill]] %s3049_s0  ;;  %s3080_s29 = sld [smem:[#allocation3_spill]]  ;;  %2186 = vmatprep.subr.bf16.mxu0 %v2497_v0  ;;  %2188 = vmatprep.mubr.msk.bf16.mxu0 %vm2498_vm0, %v2497_v0  ;;  %v2687_v30 = vld [vmem:[%s3052_s2] sm:$0xff]  ;;  %v2698_v39 = vld [vmem:[%s3052_s2 + $0x10] sm:$0xff]  ;;  %v2705_v45 = vld [vmem:[%s3052_s2 + $0x18] sm:$0xff]  ;;  %vm675_vm4 = vcmask 195584  }
   0x3   :  { %3079 = sst [smem:[#allocation5_spill]] %s3050_s1  ;;  %s3081_s20 = sld [smem:[#allocation4_spill]]  ;;  %v2712_v51 = vld [vmem:[%s3052_s2 + $0x20] sm:$0xff]  ;;  %v2718_v56 = vld [vmem:[%s3052_s2 + $0x28] sm:$0xff]  ;;  %v2726_v63 = vld [vmem:[%s3052_s2 + $0x30] sm:$0xff]  ;;  %vm903_vm5 = vcmask 523264  }
   0x4   :  { %s3082_s24 = sld [smem:[#allocation5_spill]]  ;;  %s2502_s0 = smov 88   ;;  %vm2000_vm6 = vcmask 254976   ;;  %vm2012_vm7 = vcmask 1024  }
   0x5   :  { %s2504_s21 = smov 72   ;;  %s2505_s22 = smov 104  }
   0x6   :  { %s3074_s25 = smov 48   ;;  %s3070_s26 = smov 40  }
   0x7   :  { %s3072_s27 = smov 16   ;;  %s3071_s28 = smov 24  }
   0x8   :  { %v2397_v1 = vld [vmem:[%s3080_s29] sm:$0xff]   ;;  %v2398_v2 = vld [vmem:[%s3080_s29 + $0x8] sm:$0xff]   ;;  %s3088_s1 = smov 16  }
   0x9   :  { %2173 = vmatpush3.bf16.msra.mxu1 %v2397_v1  ;;  %v62_v3 = vld [vmem:[%s3081_s20] sm:$0xff]  ;;  %v63_v4 = vld [vmem:[%s3081_s20 + $0x8] sm:$0xff]  ;;  %s2503_s20 = smov 112  }
   0xa   :  { %v64_v5 = vld [vmem:[%s3082_s24] sm:$0xff]  ;;  %2174 = vmatprep.subr.bf16.mxu1 %v2497_v0  ;;  %v65_v6 = vld [vmem:[%s3082_s24 + $0x8] sm:$0xff]  ;;  %s3075_s24 = smov 64  }
   0xb   :  { %v2634_v7 = vadd.f32 %v64_v5, %v62_v3  ;;  %v2636_v8 = vadd.f32 %v65_v6, %v63_v4  ;;  %v2732_v5 = vld [vmem:[%s3052_s2 + $0x38] sm:$0xff]  ;;  %s3076_s2 = smov 56  }
   0xd   :  { %2175 = vmatpush3.bf16.msra.mxu1 %v2398_v2  ;;  %v76_v9 = vpack.c.bf16 %v2636_v8, %v2634_v7 }
   0xe   :  { %2180 = vmatprep.subr.bf16.mxu1 %v2497_v0 }
  0x10   :  { %2177 = vmatmul.mubr.msk.bf16.vlgmr.msra.gmra.mrb[0].mxu1 %vm100_vm1, %v76_v9 }
  0x11   :  { %2182 = vmatprep.mubr.msk.bf16.mxu1 %vm2498_vm0, %v2497_v0 }
  0xe3   :  { %v138_v11 = vpop.f32.mrb[0].mxu1 }
  0xe4   :  { %v2178_v12 = vpop.f32.mrb[1].mxu1  ;;  %v139_v14 = vadd.f32 %v2018_v10, %v138_v11 }
  0xe5   :  { %v141_v13 = vpop.f32.mrb[2].mxu1 }
  0xe6   :  { %v142_v15 = vadd.f32 %v2018_v10, %v141_v13  ;;  %v2179_v16 = vpop.f32.mrb[3].mxu1 }
  0xe8   :  { %v2647_v17 = vpack.c.bf16 %v142_v15, %v139_v14 }
  0xea   :  { %250 = vrot.lane.b32.xlu1 %v2647_v17, %s2499_s30  ;;  %147 = vrot.lane.b32.xlu0 %v2647_v17, %s2500_s4 }
  0xee   :  { %197 = vrot.lane.b32.xlu1 %v2647_v17, %s2501_s19  ;;  %199 = vrot.lane.b32.xlu0 %v2647_v17, %s2502_s0 }
  0xf2   :  { %248 = vrot.lane.b32.xlu1 %v2647_v17, %s2503_s20  ;;  %301 = vrot.lane.b32.xlu0 %v2647_v17, %s2504_s21 }
  0xf6   :  { %299 = vrot.lane.b32.xlu0 %v2647_v17, %s2505_s22 }
 0x15c   :  { %v148_v18 = vpop.permute.xlu0 %147  ;;  %v251_v20 = vpop.permute.xlu1 %250 }
 0x15d   :  { %v154_v19 = vsel %vm149_vm2, %v148_v18, 0  ;;  %v256_v23 = vsel %vm149_vm2, %v251_v20, 0 }
 0x15e   :  { %2181 = vmatpush3.bf16.xpose.msra.mxu1 %v154_v19 }
 0x15f   :  { %2192 = vmatprep.subr.bf16.mxu1 %v2497_v0 }
 0x160   :  { %v200_v21 = vpop.permute.xlu0 %199  ;;  %v198_v24 = vpop.permute.xlu1 %197 }
 0x161   :  { %v205_v22 = vsel %vm149_vm2, %v200_v21, 0 }
 0x162   :  { %2187 = vmatpush3.bf16.xpose.msra.mxu0 %v205_v22 }
 0x163   :  { %2198 = vmatprep.subr.bf16.mxu0 %v2497_v0 }
 0x164   :  { %v302_v25 = vpop.permute.xlu0 %301  ;;  %v249_v27 = vpop.permute.xlu1 %248 }
 0x165   :  { %2183 = vmatmul.mubr.msk.bf16.vlgmr.msra.gmra.mrb[4].mxu1 %vm149_vm2, %v2647_v17  ;;  %v307_v26 = vsel %vm149_vm2, %v302_v25, 0 }
 0x166   :  { %2193 = vmatpush3.bf16.xpose.msra.mxu1 %v256_v23  ;;  %2194 = vmatprep.mubr.msk.bf16.mxu1 %vm2498_vm0, %v2497_v0 }
 0x167   :  { %2204 = vmatprep.subr.bf16.mxu1 %v2497_v0 }
 0x168   :  { %v300_v28 = vpop.permute.xlu0 %299 }
 0x169   :  { %2189 = vmatmul.mubr.msk.bf16.vlgmr.msra.gmra.mrb[0].mxu0 %vm149_vm2, %v198_v24 }
 0x16a   :  { %2199 = vmatpush3.bf16.xpose.msra.mxu0 %v307_v26  ;;  %2200 = vmatprep.mubr.msk.bf16.mxu0 %vm2498_vm0, %v2497_v0 }
 0x16b   :  { %2210 = vmatprep.subr.bf16.mxu0 %v2497_v0 }
 0x16d   :  { %2195 = vmatmul.mubr.msk.bf16.vlgmr.msra.gmra.mrb[8].mxu1 %vm149_vm2, %v249_v27 }
 0x16e   :  { %2206 = vmatprep.mubr.msk.bf16.mxu1 %vm2498_vm0, %v2497_v0 }
 0x171   :  { %2201 = vmatmul.mubr.msk.bf16.vlgmr.msra.gmra.mrb[4].mxu0 %vm149_vm2, %v300_v28 }
 0x172   :  { %2212 = vmatprep.mubr.msk.bf16.mxu0 %vm2498_vm0, %v2497_v0 }
 0x238   :  { %v190_v29 = vpop.f32.mrb[4].mxu1 }
 0x239   :  { %v350_v31 = vmul.f32 0.35355338, %v190_v29  ;;  %v2184_v32 = vpop.f32.mrb[5].mxu1 }
 0x23a   :  { %v193_v33 = vpop.f32.mrb[6].mxu1 }
 0x23b   :  { %v351_v35 = vmul.f32 0.35355338, %v193_v33  ;;  %v2185_v36 = vpop.f32.mrb[7].mxu1  ;;  %v358_v37 = vadd.f32 %v350_v31, %v2687_v30 }
 0x23c   :  { %v241_v38 = vpop.f32.mrb[0].mxu0 }
 0x23d   :  { %v352_v40 = vmul.f32 0.35355338, %v241_v38  ;;  %v2190_v41 = vpop.f32.mrb[1].mxu0  ;;  %v367_v42 = vsel %vm366_vm3, %v358_v37, -inf  ;;  %v359_v43 = vadd.f32 %v351_v35, %v2692_v34 }
 0x23e   :  { %v244_v44 = vpop.f32.mrb[2].mxu0  ;;  %368 = vmax.xlane.f32.xlu1 %v367_v42 }
 0x23f   :  { %v353_v46 = vmul.f32 0.35355338, %v244_v44  ;;  %v2191_v47 = vpop.f32.mrb[3].mxu0  ;;  %v370_v48 = vsel %vm366_vm3, %v359_v43, -inf  ;;  %v360_v49 = vadd.f32 %v352_v40, %v2698_v39 }
 0x240   :  { %371 = vmax.xlane.f32.xlu0 %v370_v48  ;;  %v292_v50 = vpop.f32.mrb[8].mxu1 }
 0x241   :  { %v354_v52 = vmul.f32 0.35355338, %v292_v50  ;;  %v2196_v53 = vpop.f32.mrb[9].mxu1  ;;  %v361_v54 = vadd.f32 %v353_v46, %v2705_v45  ;;  %v373_v60 = vsel %vm366_vm3, %v360_v49, -inf }
 0x242   :  { %v295_v55 = vpop.f32.mrb[10].mxu1 }
 0x243   :  { %v355_v57 = vmul.f32 0.35355338, %v295_v55  ;;  %v2197_v58 = vpop.f32.mrb[11].mxu1  ;;  %v376_v59 = vsel %vm366_vm3, %v361_v54, -inf  ;;  %v362_v61 = vadd.f32 %v354_v52, %v2712_v51 }
 0x244   :  { %v343_v62 = vpop.f32.mrb[4].mxu0  ;;  %377 = vmax.xlane.f32.xlu1 %v376_v59  ;;  %374 = vmax.xlane.f32.xlu0 %v373_v60 }
 0x245   :  { %v356_v1 = vmul.f32 0.35355338, %v343_v62  ;;  %v2202_v2 = vpop.f32.mrb[5].mxu0  ;;  %v363_v3 = vadd.f32 %v355_v57, %v2718_v56  ;;  %v379_v10 = vsel %vm366_vm3, %v362_v61, -inf }
 0x246   :  { %v346_v4 = vpop.f32.mrb[6].mxu0 }
 0x247   :  { %v357_v6 = vmul.f32 0.35355338, %v346_v4  ;;  %v2203_v9 = vpop.f32.mrb[7].mxu0  ;;  %v382_v11 = vsel %vm366_vm3, %v363_v3, -inf  ;;  %v364_v12 = vadd.f32 %v356_v1, %v2726_v63 }
 0x248   :  { %380 = vmax.xlane.f32.xlu0 %v379_v10  ;;  %383 = vmax.xlane.f32.xlu1 %v382_v11 }
 0x249   :  { %v365_v13 = vadd.f32 %v357_v6, %v2732_v5  ;;  %v385_v14 = vsel %vm366_vm3, %v364_v12, -inf }
 0x24b   :  { %v388_v15 = vsel %vm366_vm3, %v365_v13, -inf }
 0x24c   :  { %386 = vmax.xlane.f32.xlu0 %v385_v14  ;;  %389 = vmax.xlane.f32.xlu1 %v388_v15 }
 0x25d   :  { %506 = vrot.lane.b32.xlu1 %v2647_v17, %s3076_s2 }
 0x262   :  { %459 = vrot.lane.b32.xlu0 %v2647_v17, %s3075_s24 }
 0x2cb   :  { %v369_v16 = vpop.xlane.xlu1 %368 }
 0x2cc   :  { %v391_v18 = vsub.f32 %v358_v37, %v369_v16 }
 0x2cd   :  { %v372_v19 = vpop.xlane.xlu0 %371 }
 0x2ce   :  { %v399_v20 = vmul.f32 1.442695, %v391_v18  ;;  %v392_v21 = vsub.f32 %v359_v43, %v372_v19 }
 0x2d0   :  { %2417 = vpow2.f32 %v399_v20  ;;  %v401_v22 = vmul.f32 1.442695, %v392_v21 }
 0x2d1   :  { %v378_v23 = vpop.xlane.xlu1 %377  ;;  %v375_v24 = vpop.xlane.xlu0 %374 }
 0x2d2   :  { %2419 = vpow2.f32 %v401_v22  ;;  %v394_v25 = vsub.f32 %v361_v54, %v378_v23  ;;  %v393_v26 = vsub.f32 %v360_v49, %v375_v24 }
 0x2d4   :  { %v405_v27 = vmul.f32 1.442695, %v394_v25  ;;  %v403_v28 = vmul.f32 1.442695, %v393_v26 }
 0x2d5   :  { %v381_v29 = vpop.xlane.xlu0 %380  ;;  %v384_v31 = vpop.xlane.xlu1 %383 }
 0x2d6   :  { %2421 = vpow2.f32 %v405_v27  ;;  %v395_v32 = vsub.f32 %v362_v61, %v381_v29  ;;  %v396_v33 = vsub.f32 %v363_v3, %v384_v31 }
 0x2d7   :  { %2423 = vpow2.f32 %v403_v28 }
 0x2d8   :  { %v407_v35 = vmul.f32 1.442695, %v395_v32  ;;  %v409_v36 = vmul.f32 1.442695, %v396_v33 }
 0x2d9   :  { %v387_v37 = vpop.xlane.xlu0 %386  ;;  %v390_v38 = vpop.xlane.xlu1 %389 }
 0x2da   :  { %v2418_v40 = vpop.eup %2417  ;;  %2425 = vpow2.f32 %v407_v35  ;;  %v397_v41 = vsub.f32 %v364_v12, %v387_v37  ;;  %v398_v42 = vsub.f32 %v365_v13, %v390_v38 }
 0x2db   :  { %2427 = vpow2.f32 %v409_v36  ;;  %v415_v43 = vsel %vm366_vm3, %v2418_v40, 0.0 }
 0x2dc   :  { %v2420_v44 = vpop.eup %2419  ;;  %v411_v46 = vmul.f32 1.442695, %v397_v41  ;;  %v413_v47 = vmul.f32 1.442695, %v398_v42  ;;  %416 = vadd.xlane.f32.xlu0 %v415_v43  ;;  %v2399_v42 = vld [vmem:[%s3053_s6] sm:$0xff]  }
 0x2dd   :  { %v460_v48 = vpop.permute.xlu0 %459  ;;  %v507_v49 = vpop.permute.xlu1 %506  ;;  %v418_v50 = vsel %vm366_vm3, %v2420_v44, 0.0 }
 0x2de   :  { %2429 = vpow2.f32 %v411_v46  ;;  %2205 = vmatpush3.bf16.msra.mxu1 %v460_v48  ;;  %419 = vadd.xlane.f32.xlu1 %v418_v50 }
 0x2df   :  { %2431 = vpow2.f32 %v413_v47  ;;  %2211 = vmatpush3.bf16.msra.mxu0 %v507_v49  ;;  %2216 = vmatprep.subr.bf16.mxu1 %v2497_v0  ;;  %v2400_v47 = vld [vmem:[%s3053_s6 + $0x8] sm:$0xff]  }
 0x2e0   :  { %v2422_v52 = vpop.eup %2421  ;;  %2222 = vmatprep.subr.bf16.mxu0 %v2497_v0 }
 0x2e1   :  { %v2424_v53 = vpop.eup %2423  ;;  %v424_v54 = vsel %vm366_vm3, %v2422_v52, 0.0 }
 0x2e2   :  { %v421_v55 = vsel %vm366_vm3, %v2424_v53, 0.0  ;;  %425 = vadd.xlane.f32.xlu1 %v424_v54 }
 0x2e3   :  { %422 = vadd.xlane.f32.xlu0 %v421_v55 }
 0x2e4   :  { %v2426_v57 = vpop.eup %2425 }
 0x2e5   :  { %v2428_v58 = vpop.eup %2427  ;;  %v427_v59 = vsel %vm366_vm3, %v2426_v57, 0.0 }
 0x2e6   :  { %v430_v60 = vsel %vm366_vm3, %v2428_v58, 0.0 }
 0x2e7   :  { %428 = vadd.xlane.f32.xlu0 %v427_v59  ;;  %431 = vadd.xlane.f32.xlu1 %v430_v60 }
 0x2e8   :  { %v2430_v61 = vpop.eup %2429 }
 0x2e9   :  { %v2432_v62 = vpop.eup %2431  ;;  %v433_v1 = vsel %vm366_vm3, %v2430_v61, 0.0 }
 0x2ea   :  { %v436_v2 = vsel %vm366_vm3, %v2432_v62, 0.0 }
 0x2eb   :  { %434 = vadd.xlane.f32.xlu0 %v433_v1  ;;  %437 = vadd.xlane.f32.xlu1 %v436_v2 }
 0x2fc   :  { %553 = vrot.lane.b32.xlu1 %v2647_v17, %s3074_s25 }
 0x301   :  { %600 = vrot.lane.b32.xlu0 %v2647_v17, %s3070_s26  ;;  %s3073_s26 = smov 8  }
 0x369   :  { %v417_v3 = vpop.xlane.xlu0 %416 }
 0x36a   :  { %2433 = vrcp.f32 %v417_v3 }
 0x36b   :  { %v420_v4 = vpop.xlane.xlu1 %419 }
 0x36c   :  { %2435 = vrcp.f32 %v420_v4 }
 0x36f   :  { %v426_v6 = vpop.xlane.xlu1 %425 }
 0x370   :  { %v423_v9 = vpop.xlane.xlu0 %422  ;;  %2437 = vrcp.f32 %v426_v6 }
 0x371   :  { %2439 = vrcp.f32 %v423_v9 }
 0x374   :  { %v2434_v10 = vpop.eup %2433  ;;  %v429_v11 = vpop.xlane.xlu0 %428 }
 0x375   :  { %v432_v12 = vpop.xlane.xlu1 %431  ;;  %2441 = vrcp.f32 %v429_v11  ;;  %v447_v14 = vmul.f32 %v2434_v10, %v2418_v40 }
 0x376   :  { %v2436_v13 = vpop.eup %2435  ;;  %2443 = vrcp.f32 %v432_v12 }
 0x377   :  { %v448_v15 = vmul.f32 %v2436_v13, %v2420_v44 }
 0x378   :  { %v435_v16 = vpop.xlane.xlu0 %434 }
 0x379   :  { %v438_v18 = vpop.xlane.xlu1 %437  ;;  %2445 = vrcp.f32 %v435_v16  ;;  %v455_v17 = vpack.c.bf16 %v448_v15, %v447_v14 }
 0x37a   :  { %v2438_v19 = vpop.eup %2437  ;;  %2447 = vrcp.f32 %v438_v18 }
 0x37b   :  { %v2440_v20 = vpop.eup %2439  ;;  %v450_v21 = vmul.f32 %v2438_v19, %v2422_v52  ;;  %2207 = vmatmul.mubr.msk.bf16.vlgmr.msra.gmra.mrb[12].mxu1 %vm366_vm3, %v455_v17 }
 0x37c   :  { %v449_v22 = vmul.f32 %v2440_v20, %v2424_v53  ;;  %2218 = vmatprep.mubr.msk.bf16.mxu1 %vm2498_vm0, %v2497_v0  ;;  %v601_v28 = vpop.permute.xlu0 %600  ;;  %v2030_v20 = vld [vmem:[%s3054_s7] ss:$0 sm:$0xff] }
 0x37d   :  { %v554_v23 = vpop.permute.xlu1 %553 }
 0x37e   :  { %2217 = vmatpush3.bf16.msra.mxu1 %v554_v23  ;;  %v456_v24 = vpack.c.bf16 %v450_v21, %v449_v22 }
 0x37f   :  { %2228 = vmatprep.subr.bf16.mxu1 %v2497_v0  ;;  %v2442_v25 = vpop.eup %2441 }
 0x380   :  { %v2444_v26 = vpop.eup %2443  ;;  %v451_v27 = vmul.f32 %v2442_v25, %v2426_v57  ;;  %2213 = vmatmul.mubr.msk.bf16.vlgmr.msra.gmra.mrb[8].mxu0 %vm366_vm3, %v456_v24 }
 0x381   :  { %v452_v29 = vmul.f32 %v2444_v26, %v2428_v58  ;;  %2223 = vmatpush3.bf16.msra.mxu0 %v601_v28  ;;  %2224 = vmatprep.mubr.msk.bf16.mxu0 %vm2498_vm0, %v2497_v0 }
 0x382   :  { %2236 = vmatprep.subr.bf16.mxu0 %v2497_v0 }
 0x383   :  { %v2446_v31 = vpop.eup %2445  ;;  %v457_v32 = vpack.c.bf16 %v452_v29, %v451_v27 }
 0x384   :  { %v2448_v33 = vpop.eup %2447  ;;  %v453_v35 = vmul.f32 %v2446_v31, %v2430_v61 }
 0x385   :  { %v454_v36 = vmul.f32 %v2448_v33, %v2432_v62  ;;  %2219 = vmatmul.mubr.msk.bf16.vlgmr.msra.gmra.mrb[16].mxu1 %vm366_vm3, %v457_v32 }
 0x386   :  { %2232 = vmatprep.mubr.msk.bf16.mxu1 %vm2498_vm0, %v2497_v0  ;;  %2229 = vmatpush3.bf16.msra.mxu1 %v2399_v42 }
 0x387   :  { %v458_v37 = vpack.c.bf16 %v454_v36, %v453_v35  ;;  %2230 = vmatprep.subr.bf16.mxu1 %v2497_v0 }
 0x389   :  { %2225 = vmatmul.mubr.msk.bf16.vlgmr.msra.gmra.mrb[12].mxu0 %vm366_vm3, %v458_v37 }
 0x38a   :  { %2240 = vmatprep.mubr.msk.bf16.mxu0 %vm2498_vm0, %v2497_v0  ;;  %2231 = vmatpush3.bf16.msra.mxu1 %v2400_v47 }
 0x38b   :  { %2244 = vmatprep.subr.bf16.mxu1 %v2497_v0 }
 0x44e   :  { %v499_v38 = vpop.f32.mrb[12].mxu1 }
 0x44f   :  { %v2208_v40 = vpop.f32.mrb[13].mxu1 }
 0x450   :  { %v502_v41 = vpop.f32.mrb[14].mxu1 }
 0x451   :  { %v2209_v43 = vpop.f32.mrb[15].mxu1 }
 0x452   :  { %v2402_v43 = vld [vmem:[%s3055_s10 + $0x8] sm:$0xff]  }
 0x453   :  { %v546_v44 = vpop.f32.mrb[8].mxu0 }
 0x454   :  { %v2214_v46 = vpop.f32.mrb[9].mxu0 }
 0x455   :  { %v549_v48 = vpop.f32.mrb[10].mxu0  ;;  %v2404_v46 = vld [vmem:[%s3056_s12 + $0x8] sm:$0xff]  }
 0x456   :  { %v2367_v49 = vpack.i.bf16 %v549_v48, %v546_v44  ;;  %v2215_v50 = vpop.f32.mrb[11].mxu0  ;;  %v2403_v44 = vld [vmem:[%s3056_s12] sm:$0xff]  }
 0x458   :  { %v593_v52 = vpop.f32.mrb[16].mxu1  ;;  %2368 = vrot.lane.b32.xlu1 %v2367_v49, %s3073_s26 }
 0x459   :  { %v2220_v53 = vpop.f32.mrb[17].mxu1 }
 0x45a   :  { %v596_v54 = vpop.f32.mrb[18].mxu1 }
 0x45b   :  { %v2372_v55 = vpack.i.bf16 %v596_v54, %v593_v52  ;;  %v2221_v57 = vpop.f32.mrb[19].mxu1 }
 0x45c   :  { %v640_v58 = vpop.f32.mrb[12].mxu0  ;;  %v2034_v57 = vld [vmem:[%s3057_s8] ss:$0 sm:$0xff] }
 0x45d   :  { %v2226_v59 = vpop.f32.mrb[13].mxu0  ;;  %2373 = vrot.lane.b32.xlu0 %v2372_v55, %s3072_s27 }
 0x45e   :  { %v643_v60 = vpop.f32.mrb[14].mxu0 }
 0x45f   :  { %v2377_v61 = vpack.i.bf16 %v643_v60, %v640_v58  ;;  %v2227_v62 = vpop.f32.mrb[15].mxu0 }
 0x461   :  { %2378 = vrot.lane.b32.xlu1 %v2377_v61, %s3071_s28  ;;  %v2035_v61 = vld [vmem:[%s3058_s9] ss:$0 sm:$0xff]  ;;  %s3087_s28 = smov 8  }
 0x4ca   :  { %v2369_v1 = vpop.permute.xlu1 %2368 }
 0x4cb   :  { %v2371_v3 = vunpack.i.h.bf16 %v2369_v1  ;;  %v2370_v4 = vunpack.i.l.bf16 %v2369_v1 }
 0x4cd   :  { %v671_v11 = vsel %vm149_vm2, %v499_v38, %v2370_v4  ;;  %v672_v12 = vsel %vm149_vm2, %v502_v41, %v2371_v3  ;;  %v2405_v4 = vld [vmem:[%s3056_s12 + $0x10] sm:$0xff]  }
 0x4cf   :  { %v2374_v2 = vpop.permute.xlu0 %2373 }
 0x4d0   :  { %v2376_v6 = vunpack.i.h.bf16 %v2374_v2  ;;  %v2375_v9 = vunpack.i.l.bf16 %v2374_v2 }
 0x4d2   :  { %v674_v15 = vsel %vm366_vm3, %v672_v12, %v2376_v6  ;;  %v673_v16 = vsel %vm366_vm3, %v671_v11, %v2375_v9  ;;  %v2406_v6 = vld [vmem:[%s3056_s12 + $0x18] sm:$0xff]   ;;  %v2036_v9 = vld [vmem:[%s3059_s11] ss:$0 sm:$0xff] }
 0x4d3   :  { %v2379_v10 = vpop.permute.xlu1 %2378 }
 0x4d4   :  { %v2381_v13 = vunpack.i.h.bf16 %v2379_v10  ;;  %v2380_v14 = vunpack.i.l.bf16 %v2379_v10 }
 0x4d6   :  { %v676_v18 = vsel %vm675_vm4, %v673_v16, %v2380_v14  ;;  %v677_v17 = vsel %vm675_vm4, %v674_v15, %v2381_v13 }
 0x4d7   :  { %v678_v19 = vpack.c.bf16 %v677_v17, %v676_v18 }
 0x4d9   :  { %2233 = vmatmul.mubr.msk.bf16.vlgmr.msra.gmra.mrb[20].mxu1 %vm100_vm1, %v678_v19  ;;  %v2040_v19 = vld [vmem:[%s3060_s13] ss:$0 sm:$0xff] }
 0x4da   :  { %2252 = vmatprep.mubr.msk.bf16.mxu1 %vm2498_vm0, %v2497_v0  ;;  %2245 = vmatpush3.bf16.msra.mxu1 %v2403_v44 }
 0x4db   :  { %2246 = vmatprep.subr.bf16.mxu1 %v2497_v0 }
 0x4de   :  { %2247 = vmatpush3.bf16.msra.mxu1 %v2404_v46 }
 0x4df   :  { %2248 = vmatprep.subr.bf16.mxu1 %v2497_v0 }
 0x4e2   :  { %2249 = vmatpush3.bf16.msra.mxu1 %v2405_v4 }
 0x4e3   :  { %2250 = vmatprep.subr.bf16.mxu1 %v2497_v0 }
 0x4e6   :  { %2251 = vmatpush3.bf16.msra.mxu1 %v2406_v6 }
 0x4e7   :  { %2270 = vmatprep.subr.bf16.mxu1 %v2497_v0 }
 0x5ac   :  { %v739_v21 = vpop.f32.mrb[20].mxu1 }
 0x5ad   :  { %v740_v22 = vadd.f32 %v2030_v20, %v739_v21  ;;  %v2234_v23 = vpop.f32.mrb[21].mxu1 }
 0x5ae   :  { %v742_v24 = vpop.f32.mrb[22].mxu1 }
 0x5af   :  { %v743_v25 = vadd.f32 %v2030_v20, %v742_v24  ;;  %v2235_v26 = vpop.f32.mrb[23].mxu1  ;;  %v746_v27 = vadd.f32 %v740_v22, %v2634_v7 }
 0x5b1   :  { %v748_v28 = vsel %vm100_vm1, %v746_v27, 0.0  ;;  %v747_v29 = vadd.f32 %v743_v25, %v2636_v8  ;;  %v2401_v8 = vld [vmem:[%s3055_s10] sm:$0xff]  }
 0x5b2   :  { %749 = vadd.xlane.f32.xlu0 %v748_v28  ;;  %2237 = vmatpush3.bf16.msra.mxu0 %v2401_v8  ;;  %v2408_v8 = vld [vmem:[%s3080_s29 + $0x18] sm:$0xff]  }
 0x5b3   :  { %v751_v31 = vsel %vm100_vm1, %v747_v29, 0.0  ;;  %2238 = vmatprep.subr.bf16.mxu0 %v2497_v0 }
 0x5b4   :  { %752 = vadd.xlane.f32.xlu1 %v751_v31 }
 0x5b6   :  { %2239 = vmatpush3.bf16.msra.mxu0 %v2402_v43 }
 0x5b7   :  { %2256 = vmatprep.subr.bf16.mxu0 %v2497_v0 }
 0x63f   :  { %v750_v32 = vpop.xlane.xlu0 %749 }
 0x640   :  { %v755_v33 = vmul.f32 0.03125, %v750_v32 }
 0x641   :  { %v753_v35 = vpop.xlane.xlu1 %752 }
 0x642   :  { %v757_v36 = vsub.f32 %v746_v27, %v755_v33  ;;  %v756_v37 = vmul.f32 0.03125, %v753_v35 }
 0x644   :  { %v758_v38 = vsub.f32 %v747_v29, %v756_v37  ;;  %v759_v40 = vmul.f32 %v757_v36, %v757_v36 }
 0x646   :  { %v761_v41 = vsel %vm100_vm1, %v759_v40, 0.0  ;;  %v760_v42 = vmul.f32 %v758_v38, %v758_v38 }
 0x647   :  { %762 = vadd.xlane.f32.xlu0 %v761_v41 }
 0x648   :  { %v764_v7 = vsel %vm100_vm1, %v760_v42, 0.0 }
 0x64b   :  { %765 = vadd.xlane.f32.xlu0 %v764_v7  ;;  %v2407_v7 = vld [vmem:[%s3080_s29 + $0x10] sm:$0xff]  }
 0x6d4   :  { %v763_v47 = vpop.xlane.xlu0 %762 }
 0x6d5   :  { %v767_v48 = vmul.f32 0.03125, %v763_v47 }
 0x6d7   :  { %v769_v49 = vadd.f32 1e-05, %v767_v48 }
 0x6d8   :  { %v766_v50 = vpop.xlane.xlu0 %765 }
 0x6d9   :  { %2449 = vrsqrt.f32 %v769_v49  ;;  %v768_v52 = vmul.f32 0.03125, %v766_v50 }
 0x6db   :  { %v770_v53 = vadd.f32 1e-05, %v768_v52  ;;  %v2046_v52 = vld [vmem:[%s3061_s14] ss:$0 sm:$0xff] }
 0x6dd   :  { %2451 = vrsqrt.f32 %v770_v53 }
 0x6e3   :  { %v2450_v54 = vpop.eup %2449 }
 0x6e4   :  { %v773_v55 = vmul.f32 %v2450_v54, %v757_v36 }
 0x6e6   :  { %v782_v59 = vmul.f32 %v2034_v57, %v773_v55 }
 0x6e7   :  { %v2452_v58 = vpop.eup %2451 }
 0x6e8   :  { %v774_v60 = vmul.f32 %v2452_v58, %v758_v38  ;;  %v791_v1 = vadd.f32 %v2035_v61, %v782_v59  ;;  %v2047_v58 = vld [vmem:[%s3062_s15] ss:$0 sm:$0xff] }
 0x6ea   :  { %v783_v62 = vmul.f32 %v2034_v57, %v774_v60 }
 0x6ec   :  { %v792_v2 = vadd.f32 %v2035_v61, %v783_v62 }
 0x6ee   :  { %v793_v3 = vpack.c.bf16 %v792_v2, %v791_v1 }
 0x6f0   :  { %2241 = vmatmul.mubr.msk.bf16.vlgmr.msra.gmra.mrb[16].mxu0 %vm100_vm1, %v793_v3 }
 0x6f1   :  { %2260 = vmatprep.mubr.msk.bf16.mxu0 %vm2498_vm0, %v2497_v0  ;;  %2257 = vmatpush3.bf16.msra.mxu0 %v2407_v7 }
 0x6f2   :  { %2258 = vmatprep.subr.bf16.mxu0 %v2497_v0 }
 0x6f5   :  { %2259 = vmatpush3.bf16.msra.mxu0 %v2408_v8 }
 0x6f6   :  { %2264 = vmatprep.subr.bf16.mxu0 %v2497_v0 }
 0x7c3   :  { %v854_v10 = vpop.f32.mrb[16].mxu0 }
 0x7c4   :  { %v855_v11 = vadd.f32 %v2036_v9, %v854_v10  ;;  %v2242_v12 = vpop.f32.mrb[17].mxu0 }
 0x7c5   :  { %v857_v13 = vpop.f32.mrb[18].mxu0 }
 0x7c6   :  { %v858_v14 = vadd.f32 %v2036_v9, %v857_v13  ;;  %v2243_v15 = vpop.f32.mrb[19].mxu0  ;;  %v861_v16 = vmax.f32 %v855_v11, 0.0 }
 0x7c8   :  { %v862_v18 = vmax.f32 %v858_v14, 0.0 }
 0x7ca   :  { %v863_v17 = vpack.c.bf16 %v862_v18, %v861_v16 }
 0x7cc   :  { %2253 = vmatmul.mubr.msk.bf16.vlgmr.msra.gmra.mrb[24].mxu1 %vm903_vm5, %v863_v17 }
 0x7cd   :  { %2272 = vmatprep.mubr.msk.bf16.mxu1 %vm2498_vm0, %v2497_v0 }
 0x89f   :  { %v941_v20 = vpop.f32.mrb[24].mxu1 }
 0x8a0   :  { %v942_v21 = vadd.f32 %v2040_v19, %v941_v20  ;;  %v2254_v22 = vpop.f32.mrb[25].mxu1 }
 0x8a1   :  { %v944_v23 = vpop.f32.mrb[26].mxu1 }
 0x8a2   :  { %v945_v24 = vadd.f32 %v2040_v19, %v944_v23  ;;  %v2255_v25 = vpop.f32.mrb[27].mxu1  ;;  %v948_v26 = vadd.f32 %v942_v21, %v791_v1  ;;  %v2053_v1 = vld [vmem:[%s3051_s5 + $0x1] ss:$0 sm:$0xff]  ;;  %s3083_s5 = smov 56  }
 0x8a4   :  { %v950_v27 = vsel %vm100_vm1, %v948_v26, 0.0  ;;  %v949_v28 = vadd.f32 %v945_v24, %v792_v2 }
 0x8a5   :  { %951 = vadd.xlane.f32.xlu1 %v950_v27 }
 0x8a6   :  { %v953_v29 = vsel %vm100_vm1, %v949_v28, 0.0 }
 0x8a7   :  { %954 = vadd.xlane.f32.xlu0 %v953_v29 }
 0x932   :  { %v952_v31 = vpop.xlane.xlu1 %951 }
 0x933   :  { %v956_v32 = vmul.f32 0.03125, %v952_v31 }
 0x934   :  { %v955_v33 = vpop.xlane.xlu0 %954 }
 0x935   :  { %v958_v35 = vsub.f32 %v948_v26, %v956_v32  ;;  %v957_v36 = vmul.f32 0.03125, %v955_v33 }
 0x937   :  { %v959_v37 = vsub.f32 %v949_v28, %v957_v36  ;;  %v960_v38 = vmul.f32 %v958_v35, %v958_v35 }
 0x939   :  { %v962_v40 = vsel %vm100_vm1, %v960_v38, 0.0  ;;  %v961_v41 = vmul.f32 %v959_v37, %v959_v37 }
 0x93a   :  { %963 = vadd.xlane.f32.xlu1 %v962_v40 }
 0x93b   :  { %v965_v42 = vsel %vm100_vm1, %v961_v41, 0.0 }
 0x93c   :  { %966 = vadd.xlane.f32.xlu0 %v965_v42 }
 0x9c7   :  { %v964_v43 = vpop.xlane.xlu1 %963 }
 0x9c8   :  { %v968_v44 = vmul.f32 0.03125, %v964_v43 }
 0x9c9   :  { %v967_v46 = vpop.xlane.xlu0 %966 }
 0x9ca   :  { %v970_v47 = vadd.f32 1e-05, %v968_v44  ;;  %v969_v48 = vmul.f32 0.03125, %v967_v46 }
 0x9cc   :  { %2453 = vrsqrt.f32 %v970_v47  ;;  %v971_v49 = vadd.f32 1e-05, %v969_v48 }
 0x9ce   :  { %2455 = vrsqrt.f32 %v971_v49 }
 0x9d6   :  { %v2454_v50 = vpop.eup %2453 }
 0x9d7   :  { %v974_v53 = vmul.f32 %v2454_v50, %v958_v35 }
 0x9d8   :  { %v2456_v54 = vpop.eup %2455 }
 0x9d9   :  { %v983_v55 = vmul.f32 %v2046_v52, %v974_v53  ;;  %v975_v57 = vmul.f32 %v2456_v54, %v959_v37 }
 0x9db   :  { %v984_v59 = vmul.f32 %v2046_v52, %v975_v57  ;;  %v2861_v60 = vadd.f32 %v2047_v58, %v983_v55 }
 0x9dd   :  { %v2863_v61 = vadd.f32 %v2047_v58, %v984_v59 }
 0x9df   :  { %v994_v62 = vpack.c.bf16 %v2863_v61, %v2861_v60 }
 0x9e1   :  { %2261 = vmatmul.mubr.msk.bf16.vlgmr.msra.gmra.mrb[20].mxu0 %vm100_vm1, %v994_v62 }
 0x9e2   :  { %2266 = vmatprep.mubr.msk.bf16.mxu0 %vm2498_vm0, %v2497_v0 }
 0xab4   :  { %v1057_v2 = vpop.f32.mrb[20].mxu0 }
 0xab5   :  { %v2262_v3 = vpop.f32.mrb[21].mxu0  ;;  %v1058_v6 = vadd.f32 %v2053_v1, %v1057_v2 }
 0xab6   :  { %v1060_v4 = vpop.f32.mrb[22].mxu0 }
 0xab7   :  { %v1061_v9 = vadd.f32 %v2053_v1, %v1060_v4  ;;  %v2263_v10 = vpop.f32.mrb[23].mxu0 }
 0xab9   :  { %v2873_v11 = vpack.c.bf16 %v1061_v9, %v1058_v6 }
 0xabb   :  { %1117 = vrot.lane.b32.xlu0 %v2873_v11, %s2502_s0  ;;  %1066 = vrot.lane.b32.xlu1 %v2873_v11, %s2500_s4  ;;  %s3085_s4 = smov 48  }
 0xabf   :  { %1219 = vrot.lane.b32.xlu0 %v2873_v11, %s2504_s21  ;;  %1168 = vrot.lane.b32.xlu1 %v2873_v11, %s2499_s30  ;;  %s3084_s30 = smov 64  }
 0xac3   :  { %1217 = vrot.lane.b32.xlu0 %v2873_v11, %s2505_s22  ;;  %1115 = vrot.lane.b32.xlu1 %v2873_v11, %s2501_s19  ;;  %s3086_s19 = smov 40  }
 0xac7   :  { %1166 = vrot.lane.b32.xlu1 %v2873_v11, %s2503_s20 }
 0xb2d   :  { %v1118_v12 = vpop.permute.xlu0 %1117  ;;  %v1067_v13 = vpop.permute.xlu1 %1066 }
 0xb2e   :  { %v1123_v14 = vsel %vm149_vm2, %v1118_v12, 0  ;;  %v1072_v15 = vsel %vm149_vm2, %v1067_v13, 0 }
 0xb2f   :  { %2265 = vmatpush3.bf16.xpose.msra.mxu0 %v1072_v15  ;;  %2271 = vmatpush3.bf16.xpose.msra.mxu1 %v1123_v14 }
 0xb30   :  { %2276 = vmatprep.subr.bf16.mxu0 %v2497_v0  ;;  %2282 = vmatprep.subr.bf16.mxu1 %v2497_v0 }
 0xb31   :  { %v1169_v16 = vpop.permute.xlu1 %1168  ;;  %v1220_v18 = vpop.permute.xlu0 %1219 }
 0xb32   :  { %v1225_v19 = vsel %vm149_vm2, %v1220_v18, 0  ;;  %v1174_v20 = vsel %vm149_vm2, %v1169_v16, 0 }
 0xb35   :  { %v1116_v17 = vpop.permute.xlu1 %1115  ;;  %v1218_v21 = vpop.permute.xlu0 %1217 }
 0xb36   :  { %2267 = vmatmul.mubr.msk.bf16.vlgmr.msra.gmra.mrb[24].mxu0 %vm149_vm2, %v2873_v11  ;;  %2273 = vmatmul.mubr.msk.bf16.vlgmr.msra.gmra.mrb[28].mxu1 %vm149_vm2, %v1116_v17 }
 0xb37   :  { %2277 = vmatpush3.bf16.xpose.msra.mxu0 %v1174_v20  ;;  %2283 = vmatpush3.bf16.xpose.msra.mxu1 %v1225_v19 }
 0xb38   :  { %2278 = vmatprep.mubr.msk.bf16.mxu0 %vm2498_vm0, %v2497_v0  ;;  %2284 = vmatprep.mubr.msk.bf16.mxu1 %vm2498_vm0, %v2497_v0 }
 0xb39   :  { %2288 = vmatprep.subr.bf16.mxu0 %v2497_v0  ;;  %2294 = vmatprep.subr.bf16.mxu1 %v2497_v0  ;;  %v1167_v22 = vpop.permute.xlu1 %1166 }
 0xb3e   :  { %2279 = vmatmul.mubr.msk.bf16.vlgmr.msra.gmra.mrb[28].mxu0 %vm149_vm2, %v1167_v22  ;;  %2285 = vmatmul.mubr.msk.bf16.vlgmr.msra.gmra.mrb[32].mxu1 %vm149_vm2, %v1218_v21 }
 0xb3f   :  { %2290 = vmatprep.mubr.msk.bf16.mxu0 %vm2498_vm0, %v2497_v0  ;;  %2296 = vmatprep.mubr.msk.bf16.mxu1 %vm2498_vm0, %v2497_v0 }
 0xc09   :  { %v1108_v23 = vpop.f32.mrb[24].mxu0  ;;  %v1159_v24 = vpop.f32.mrb[28].mxu1 }
 0xc0a   :  { %v1268_v25 = vmul.f32 0.35355338, %v1108_v23  ;;  %v2268_v26 = vpop.f32.mrb[25].mxu0  ;;  %v2274_v27 = vpop.f32.mrb[29].mxu1  ;;  %v1270_v28 = vmul.f32 0.35355338, %v1159_v24 }
 0xc0b   :  { %v1111_v29 = vpop.f32.mrb[26].mxu0  ;;  %v1162_v31 = vpop.f32.mrb[30].mxu1 }
 0xc0c   :  { %v1269_v32 = vmul.f32 0.35355338, %v1111_v29  ;;  %v1271_v33 = vmul.f32 0.35355338, %v1162_v31  ;;  %v2269_v35 = vpop.f32.mrb[27].mxu0  ;;  %v2275_v36 = vpop.f32.mrb[31].mxu1  ;;  %v1276_v37 = vadd.f32 %v1268_v25, %v2687_v30  ;;  %v1278_v42 = vadd.f32 %v1270_v28, %v2698_v39 }
 0xc0e   :  { %v1284_v38 = vsel %vm366_vm3, %v1276_v37, -inf  ;;  %v1277_v40 = vadd.f32 %v1269_v32, %v2692_v34  ;;  %v1279_v41 = vadd.f32 %v1271_v33, %v2705_v45  ;;  %v1290_v34 = vsel %vm366_vm3, %v1278_v42, -inf }
 0xc0f   :  { %1285 = vmax.xlane.f32.xlu1 %v1284_v38 }
 0xc10   :  { %v1287_v7 = vsel %vm366_vm3, %v1277_v40, -inf  ;;  %v1293_v48 = vsel %vm366_vm3, %v1279_v41, -inf }
 0xc11   :  { %1288 = vmax.xlane.f32.xlu0 %v1287_v7  ;;  %v1210_v8 = vpop.f32.mrb[28].mxu0  ;;  %v1261_v43 = vpop.f32.mrb[32].mxu1 }
 0xc12   :  { %v1272_v44 = vmul.f32 0.35355338, %v1210_v8  ;;  %v2280_v46 = vpop.f32.mrb[29].mxu0  ;;  %v2286_v47 = vpop.f32.mrb[33].mxu1  ;;  %v1274_v30 = vmul.f32 0.35355338, %v1261_v43 }
 0xc13   :  { %v1213_v49 = vpop.f32.mrb[30].mxu0  ;;  %1294 = vmax.xlane.f32.xlu1 %v1293_v48  ;;  %v1264_v50 = vpop.f32.mrb[34].mxu1 }
 0xc14   :  { %v1273_v45 = vmul.f32 0.35355338, %v1213_v49  ;;  %v1275_v52 = vmul.f32 0.35355338, %v1264_v50  ;;  %v2281_v53 = vpop.f32.mrb[31].mxu0  ;;  %v2287_v39 = vpop.f32.mrb[35].mxu1  ;;  %v1280_v54 = vadd.f32 %v1272_v44, %v2712_v51  ;;  %v1282_v59 = vadd.f32 %v1274_v30, %v2726_v63 }
 0xc15   :  { %1291 = vmax.xlane.f32.xlu0 %v1290_v34 }
 0xc16   :  { %v1281_v55 = vadd.f32 %v1273_v45, %v2718_v56  ;;  %v1296_v57 = vsel %vm366_vm3, %v1280_v54, -inf  ;;  %v1283_v62 = vadd.f32 %v1275_v52, %v2732_v5  ;;  %v1302_v1 = vsel %vm366_vm3, %v1282_v59, -inf }
 0xc18   :  { %v1299_v58 = vsel %vm366_vm3, %v1281_v55, -inf  ;;  %v1305_v2 = vsel %vm366_vm3, %v1283_v62, -inf }
 0xc19   :  { %1297 = vmax.xlane.f32.xlu0 %v1296_v57  ;;  %1300 = vmax.xlane.f32.xlu1 %v1299_v58 }
 0xc1d   :  { %1303 = vmax.xlane.f32.xlu0 %v1302_v1  ;;  %1306 = vmax.xlane.f32.xlu1 %v1305_v2 }
 0xc2e   :  { %1423 = vrot.lane.b32.xlu1 %v2873_v11, %s3083_s5 }
 0xc33   :  { %1376 = vrot.lane.b32.xlu0 %v2873_v11, %s3084_s30 }
 0xc9c   :  { %v1286_v51 = vpop.xlane.xlu1 %1285 }
 0xc9d   :  { %v1308_v56 = vsub.f32 %v1276_v37, %v1286_v51 }
 0xc9e   :  { %v1289_v3 = vpop.xlane.xlu0 %1288 }
 0xc9f   :  { %v1316_v63 = vmul.f32 1.442695, %v1308_v56  ;;  %v1309_v4 = vsub.f32 %v1277_v40, %v1289_v3 }
 0xca0   :  { %v1295_v5 = vpop.xlane.xlu1 %1294 }
 0xca1   :  { %2457 = vpow2.f32 %v1316_v63  ;;  %v1318_v6 = vmul.f32 1.442695, %v1309_v4  ;;  %v1311_v9 = vsub.f32 %v1279_v41, %v1295_v5 }
 0xca2   :  { %v1292_v10 = vpop.xlane.xlu0 %1291 }
 0xca3   :  { %2459 = vpow2.f32 %v1318_v6  ;;  %v1322_v12 = vmul.f32 1.442695, %v1311_v9  ;;  %v1310_v13 = vsub.f32 %v1278_v42, %v1292_v10 }
 0xca5   :  { %2461 = vpow2.f32 %v1322_v12  ;;  %v1320_v14 = vmul.f32 1.442695, %v1310_v13 }
 0xca6   :  { %v1298_v15 = vpop.xlane.xlu0 %1297  ;;  %v1301_v16 = vpop.xlane.xlu1 %1300 }
 0xca7   :  { %2463 = vpow2.f32 %v1320_v14  ;;  %v1312_v18 = vsub.f32 %v1280_v54, %v1298_v15  ;;  %v1313_v17 = vsub.f32 %v1281_v55, %v1301_v16 }
 0xca9   :  { %v1324_v19 = vmul.f32 1.442695, %v1312_v18  ;;  %v1326_v20 = vmul.f32 1.442695, %v1313_v17  ;;  %v2409_v18 = vld [vmem:[%s3053_s6 + $0x10] sm:$0xff]  }
 0xcaa   :  { %v1304_v21 = vpop.xlane.xlu0 %1303  ;;  %v1307_v22 = vpop.xlane.xlu1 %1306 }
 0xcab   :  { %v2458_v23 = vpop.eup %2457  ;;  %2465 = vpow2.f32 %v1324_v19  ;;  %v1314_v24 = vsub.f32 %v1282_v59, %v1304_v21  ;;  %v1315_v25 = vsub.f32 %v1283_v62, %v1307_v22  ;;  %v2410_v21 = vld [vmem:[%s3053_s6 + $0x18] sm:$0xff]   ;;  %s3089_s6 = smov 24  }
 0xcac   :  { %2467 = vpow2.f32 %v1326_v20  ;;  %v1332_v26 = vsel %vm366_vm3, %v2458_v23, 0.0 }
 0xcad   :  { %v2460_v27 = vpop.eup %2459  ;;  %v1328_v28 = vmul.f32 1.442695, %v1314_v24  ;;  %v1330_v29 = vmul.f32 1.442695, %v1315_v25  ;;  %1333 = vadd.xlane.f32.xlu0 %v1332_v26 }
 0xcae   :  { %v1377_v31 = vpop.permute.xlu0 %1376  ;;  %v1424_v32 = vpop.permute.xlu1 %1423  ;;  %v1335_v33 = vsel %vm366_vm3, %v2460_v27, 0.0 }
 0xcaf   :  { %v2462_v35 = vpop.eup %2461  ;;  %2469 = vpow2.f32 %v1328_v28  ;;  %2289 = vmatpush3.bf16.msra.mxu0 %v1377_v31  ;;  %1336 = vadd.xlane.f32.xlu1 %v1335_v33 }
 0xcb0   :  { %2471 = vpow2.f32 %v1330_v29  ;;  %2295 = vmatpush3.bf16.msra.mxu1 %v1424_v32  ;;  %2300 = vmatprep.subr.bf16.mxu0 %v2497_v0  ;;  %v1341_v38 = vsel %vm366_vm3, %v2462_v35, 0.0 }
 0xcb1   :  { %v2464_v36 = vpop.eup %2463  ;;  %2306 = vmatprep.subr.bf16.mxu1 %v2497_v0 }
 0xcb2   :  { %v1338_v37 = vsel %vm366_vm3, %v2464_v36, 0.0 }
 0xcb3   :  { %1339 = vadd.xlane.f32.xlu0 %v1338_v37  ;;  %1342 = vadd.xlane.f32.xlu1 %v1341_v38 }
 0xcb5   :  { %v2466_v40 = vpop.eup %2465 }
 0xcb6   :  { %v2468_v41 = vpop.eup %2467  ;;  %v1344_v42 = vsel %vm366_vm3, %v2466_v40, 0.0 }
 0xcb7   :  { %1345 = vadd.xlane.f32.xlu0 %v1344_v42  ;;  %v1347_v7 = vsel %vm366_vm3, %v2468_v41, 0.0 }
 0xcb8   :  { %1348 = vadd.xlane.f32.xlu1 %v1347_v7 }
 0xcb9   :  { %v2470_v8 = vpop.eup %2469 }
 0xcba   :  { %v2472_v43 = vpop.eup %2471  ;;  %v1350_v44 = vsel %vm366_vm3, %v2470_v8, 0.0 }
 0xcbb   :  { %1351 = vadd.xlane.f32.xlu0 %v1350_v44  ;;  %v1353_v46 = vsel %vm366_vm3, %v2472_v43, 0.0 }
 0xcbc   :  { %1354 = vadd.xlane.f32.xlu1 %v1353_v46 }
 0xccd   :  { %1470 = vrot.lane.b32.xlu1 %v2873_v11, %s3085_s4 }
 0xcd1   :  { %1517 = vrot.lane.b32.xlu0 %v2873_v11, %s3086_s19 }
 0xd3a   :  { %v1334_v47 = vpop.xlane.xlu0 %1333 }
 0xd3b   :  { %2473 = vrcp.f32 %v1334_v47 }
 0xd3c   :  { %v1337_v48 = vpop.xlane.xlu1 %1336 }
 0xd3d   :  { %2475 = vrcp.f32 %v1337_v48 }
 0xd40   :  { %v1340_v30 = vpop.xlane.xlu0 %1339  ;;  %v1343_v49 = vpop.xlane.xlu1 %1342 }
 0xd41   :  { %2477 = vrcp.f32 %v1340_v30 }
 0xd42   :  { %2479 = vrcp.f32 %v1343_v49 }
 0xd44   :  { %v1346_v50 = vpop.xlane.xlu0 %1345 }
 0xd45   :  { %v2474_v34 = vpop.eup %2473  ;;  %2481 = vrcp.f32 %v1346_v50  ;;  %v1349_v45 = vpop.xlane.xlu1 %1348 }
 0xd46   :  { %2483 = vrcp.f32 %v1349_v45  ;;  %v1364_v53 = vmul.f32 %v2474_v34, %v2458_v23  ;;  %v2070_v45 = vld [vmem:[%s3054_s7 + $0x1] ss:$0 sm:$0xff] }
 0xd47   :  { %v2476_v52 = vpop.eup %2475 }
 0xd48   :  { %v1365_v39 = vmul.f32 %v2476_v52, %v2460_v27  ;;  %v1352_v54 = vpop.xlane.xlu0 %1351 }
 0xd49   :  { %2485 = vrcp.f32 %v1352_v54  ;;  %v1355_v55 = vpop.xlane.xlu1 %1354 }
 0xd4a   :  { %2487 = vrcp.f32 %v1355_v55  ;;  %v1372_v11 = vpack.c.bf16 %v1365_v39, %v1364_v53 }
 0xd4b   :  { %v2478_v57 = vpop.eup %2477 }
 0xd4c   :  { %v2480_v58 = vpop.eup %2479  ;;  %v1366_v59 = vmul.f32 %v2478_v57, %v2464_v36  ;;  %2291 = vmatmul.mubr.msk.bf16.vlgmr.msra.gmra.mrb[32].mxu0 %vm366_vm3, %v1372_v11  ;;  %v1518_v4 = vpop.permute.xlu0 %1517 }
 0xd4d   :  { %v1367_v62 = vmul.f32 %v2480_v58, %v2462_v35  ;;  %v1471_v1 = vpop.permute.xlu1 %1470  ;;  %2302 = vmatprep.mubr.msk.bf16.mxu0 %vm2498_vm0, %v2497_v0 }
 0xd4e   :  { %2301 = vmatpush3.bf16.msra.mxu0 %v1471_v1 }
 0xd4f   :  { %v2482_v2 = vpop.eup %2481  ;;  %v1373_v51 = vpack.c.bf16 %v1367_v62, %v1366_v59  ;;  %2312 = vmatprep.subr.bf16.mxu0 %v2497_v0 }
 0xd50   :  { %v2484_v56 = vpop.eup %2483  ;;  %v1368_v3 = vmul.f32 %v2482_v2, %v2466_v40 }
 0xd51   :  { %v1369_v63 = vmul.f32 %v2484_v56, %v2468_v41  ;;  %2297 = vmatmul.mubr.msk.bf16.vlgmr.msra.gmra.mrb[36].mxu1 %vm366_vm3, %v1373_v51 }
 0xd52   :  { %2307 = vmatpush3.bf16.msra.mxu1 %v1518_v4  ;;  %2308 = vmatprep.mubr.msk.bf16.mxu1 %vm2498_vm0, %v2497_v0 }
 0xd53   :  { %v2486_v5 = vpop.eup %2485  ;;  %v1374_v6 = vpack.c.bf16 %v1369_v63, %v1368_v3  ;;  %2320 = vmatprep.subr.bf16.mxu1 %v2497_v0 }
 0xd54   :  { %v2488_v9 = vpop.eup %2487  ;;  %v1370_v10 = vmul.f32 %v2486_v5, %v2470_v8 }
 0xd55   :  { %v1371_v12 = vmul.f32 %v2488_v9, %v2472_v43  ;;  %2303 = vmatmul.mubr.msk.bf16.vlgmr.msra.gmra.mrb[36].mxu0 %vm366_vm3, %v1374_v6  ;;  %v2412_v9 = vld [vmem:[%s3055_s10 + $0x18] sm:$0xff]  }
 0xd56   :  { %2316 = vmatprep.mubr.msk.bf16.mxu0 %vm2498_vm0, %v2497_v0  ;;  %2313 = vmatpush3.bf16.msra.mxu0 %v2409_v18 }
 0xd57   :  { %v1375_v13 = vpack.c.bf16 %v1371_v12, %v1370_v10  ;;  %2314 = vmatprep.subr.bf16.mxu0 %v2497_v0  ;;  %v2413_v10 = vld [vmem:[%s3056_s12 + $0x20] sm:$0xff]   ;;  %v2414_v12 = vld [vmem:[%s3056_s12 + $0x28] sm:$0xff]  }
 0xd59   :  { %2309 = vmatmul.mubr.msk.bf16.vlgmr.msra.gmra.mrb[40].mxu1 %vm366_vm3, %v1375_v13 }
 0xd5a   :  { %2324 = vmatprep.mubr.msk.bf16.mxu1 %vm2498_vm0, %v2497_v0  ;;  %2315 = vmatpush3.bf16.msra.mxu0 %v2410_v21  ;;  %v2075_v21 = vld [vmem:[%s3057_s8 + $0x1] ss:$0 sm:$0xff] }
 0xd5b   :  { %2328 = vmatprep.subr.bf16.mxu0 %v2497_v0 }
 0xe1f   :  { %v1416_v14 = vpop.f32.mrb[32].mxu0 }
 0xe20   :  { %v2292_v15 = vpop.f32.mrb[33].mxu0 }
 0xe21   :  { %v1419_v16 = vpop.f32.mrb[34].mxu0 }
 0xe22   :  { %v2293_v17 = vpop.f32.mrb[35].mxu0 }
 0xe24   :  { %v1463_v19 = vpop.f32.mrb[36].mxu1 }
 0xe25   :  { %v2298_v20 = vpop.f32.mrb[37].mxu1 }
 0xe26   :  { %v1466_v22 = vpop.f32.mrb[38].mxu1 }
 0xe27   :  { %v2382_v23 = vpack.i.bf16 %v1466_v22, %v1463_v19  ;;  %v2299_v24 = vpop.f32.mrb[39].mxu1 }
 0xe28   :  { %v1510_v25 = vpop.f32.mrb[36].mxu0 }
 0xe29   :  { %v2304_v26 = vpop.f32.mrb[37].mxu0  ;;  %2383 = vrot.lane.b32.xlu1 %v2382_v23, %s3087_s28 }
 0xe2a   :  { %v1513_v27 = vpop.f32.mrb[38].mxu0 }
 0xe2b   :  { %v2387_v28 = vpack.i.bf16 %v1513_v27, %v1510_v25  ;;  %v2305_v29 = vpop.f32.mrb[39].mxu0  ;;  %v2077_v25 = vld [vmem:[%s3058_s9 + $0x1] ss:$0 sm:$0xff] }
 0xe2c   :  { %v1557_v31 = vpop.f32.mrb[40].mxu1 }
 0xe2d   :  { %2388 = vrot.lane.b32.xlu0 %v2387_v28, %s3088_s1  ;;  %v2310_v32 = vpop.f32.mrb[41].mxu1 }
 0xe2e   :  { %v1560_v33 = vpop.f32.mrb[42].mxu1  ;;  %v2416_v32 = vld [vmem:[%s3056_s12 + $0x38] sm:$0xff]  }
 0xe2f   :  { %v2392_v35 = vpack.i.bf16 %v1560_v33, %v1557_v31  ;;  %v2311_v36 = vpop.f32.mrb[43].mxu1  ;;  %v2415_v31 = vld [vmem:[%s3056_s12 + $0x30] sm:$0xff]   ;;  %v2083_v33 = vld [vmem:[%s3059_s11 + $0x1] ss:$0 sm:$0xff] }
 0xe31   :  { %2393 = vrot.lane.b32.xlu1 %v2392_v35, %s3089_s6 }
 0xe9b   :  { %v2384_v37 = vpop.permute.xlu1 %2383 }
 0xe9c   :  { %v2386_v40 = vunpack.i.h.bf16 %v2384_v37  ;;  %v2385_v41 = vunpack.i.l.bf16 %v2384_v37 }
 0xe9e   :  { %v1589_v43 = vsel %vm149_vm2, %v1419_v16, %v2386_v40  ;;  %v1588_v44 = vsel %vm149_vm2, %v1416_v14, %v2385_v41 }
 0xe9f   :  { %v2389_v38 = vpop.permute.xlu0 %2388 }
 0xea0   :  { %v2391_v42 = vunpack.i.h.bf16 %v2389_v38  ;;  %v2390_v7 = vunpack.i.l.bf16 %v2389_v38 }
 0xea2   :  { %v1590_v48 = vsel %vm366_vm3, %v1588_v44, %v2390_v7  ;;  %v1591_v30 = vsel %vm366_vm3, %v1589_v43, %v2391_v42 }
 0xea3   :  { %v2394_v8 = vpop.permute.xlu1 %2393 }
 0xea4   :  { %v2396_v46 = vunpack.i.h.bf16 %v2394_v8  ;;  %v2395_v47 = vunpack.i.l.bf16 %v2394_v8 }
 0xea6   :  { %v1593_v49 = vsel %vm675_vm4, %v1591_v30, %v2396_v46  ;;  %v1592_v50 = vsel %vm675_vm4, %v1590_v48, %v2395_v47 }
 0xea7   :  { %v1594_v34 = vpack.c.bf16 %v1593_v49, %v1592_v50 }
 0xea9   :  { %2317 = vmatmul.mubr.msk.bf16.vlgmr.msra.gmra.mrb[40].mxu0 %vm100_vm1, %v1594_v34 }
 0xeaa   :  { %2336 = vmatprep.mubr.msk.bf16.mxu0 %vm2498_vm0, %v2497_v0  ;;  %2329 = vmatpush3.bf16.msra.mxu0 %v2413_v10 }
 0xeab   :  { %2330 = vmatprep.subr.bf16.mxu0 %v2497_v0 }
 0xeae   :  { %2331 = vmatpush3.bf16.msra.mxu0 %v2414_v12  ;;  %v2105_v12 = vld [vmem:[%s3062_s15 + $0x1] ss:$0 sm:$0xff] }
 0xeaf   :  { %2332 = vmatprep.subr.bf16.mxu0 %v2497_v0 }
 0xeb2   :  { %2333 = vmatpush3.bf16.msra.mxu0 %v2415_v31 }
 0xeb3   :  { %2334 = vmatprep.subr.bf16.mxu0 %v2497_v0 }
 0xeb6   :  { %2335 = vmatpush3.bf16.msra.mxu0 %v2416_v32 }
 0xf7c   :  { %v1657_v52 = vpop.f32.mrb[40].mxu0 }
 0xf7d   :  { %v1658_v53 = vadd.f32 %v2070_v45, %v1657_v52  ;;  %v2318_v39 = vpop.f32.mrb[41].mxu0 }
 0xf7e   :  { %v1660_v54 = vpop.f32.mrb[42].mxu0 }
 0xf7f   :  { %v1661_v55 = vadd.f32 %v2070_v45, %v1660_v54  ;;  %v2319_v11 = vpop.f32.mrb[43].mxu0  ;;  %v1664_v57 = vadd.f32 %v1658_v53, %v2861_v60 }
 0xf81   :  { %v1666_v58 = vsel %vm100_vm1, %v1664_v57, 0.0  ;;  %v1665_v59 = vadd.f32 %v1661_v55, %v2863_v61  ;;  %v2411_v61 = vld [vmem:[%s3055_s10 + $0x10] sm:$0xff]  }
 0xf82   :  { %1667 = vadd.xlane.f32.xlu0 %v1666_v58  ;;  %2321 = vmatpush3.bf16.msra.mxu1 %v2411_v61 }
 0xf83   :  { %v1669_v62 = vsel %vm100_vm1, %v1665_v59, 0.0  ;;  %2322 = vmatprep.subr.bf16.mxu1 %v2497_v0 }
 0xf84   :  { %1670 = vadd.xlane.f32.xlu1 %v1669_v62 }
 0xf86   :  { %2323 = vmatpush3.bf16.msra.mxu1 %v2412_v9 }
0x100f   :  { %v1668_v1 = vpop.xlane.xlu0 %1667 }
0x1010   :  { %v1672_v2 = vmul.f32 0.03125, %v1668_v1  ;;  %v2513_v1 = vmov 0.0|0.0  }
0x1011   :  { %v1671_v51 = vpop.xlane.xlu1 %1670  ;;  %2347 = vmatprep.subr.bf16.mxu1 %v2513_v1 }
0x1012   :  { %v1674_v56 = vsub.f32 %v1664_v57, %v1672_v2  ;;  %v1673_v3 = vmul.f32 0.03125, %v1671_v51 }
0x1014   :  { %v1675_v63 = vsub.f32 %v1665_v59, %v1673_v3  ;;  %v1676_v4 = vmul.f32 %v1674_v56, %v1674_v56 }
0x1016   :  { %v1678_v5 = vsel %vm100_vm1, %v1676_v4, 0.0  ;;  %v1677_v6 = vmul.f32 %v1675_v63, %v1675_v63 }
0x1017   :  { %1679 = vadd.xlane.f32.xlu0 %v1678_v5 }
0x1018   :  { %v1681_v60 = vsel %vm100_vm1, %v1677_v6, 0.0  ;;  %v2103_v6 = vld [vmem:[%s3061_s14 + $0x1] ss:$0 sm:$0xff] }
0x101b   :  { %1682 = vadd.xlane.f32.xlu0 %v1681_v60 }
0x10a4   :  { %v1680_v13 = vpop.xlane.xlu0 %1679 }
0x10a5   :  { %v1684_v14 = vmul.f32 0.03125, %v1680_v13 }
0x10a7   :  { %v1686_v15 = vadd.f32 1e-05, %v1684_v14 }
0x10a8   :  { %v1683_v16 = vpop.xlane.xlu0 %1682 }
0x10a9   :  { %2489 = vrsqrt.f32 %v1686_v15  ;;  %v1685_v18 = vmul.f32 0.03125, %v1683_v16 }
0x10ab   :  { %v1687_v17 = vadd.f32 1e-05, %v1685_v18  ;;  %v1918_v18 = vld [vmem:[%s3063_s3] sm:$0x3] }
0x10ad   :  { %2491 = vrsqrt.f32 %v1687_v17  ;;  %v23_v17 = vstv %s3064_s17 }
0x10ae   :  { %24 = vst [vmem:[#allocation2] sm:$0x1] %v23_v17 }
0x10b3   :  { %v2490_v19 = vpop.eup %2489 }
0x10b4   :  { %v1690_v20 = vmul.f32 %v2490_v19, %v1674_v56  ;;  %v2107_v19 = vld [vmem:[%s3065_s16] ss:$0 sm:$0xff] }
0x10b6   :  { %v1700_v23 = vmul.f32 %v2075_v21, %v1690_v20 }
0x10b7   :  { %v2492_v22 = vpop.eup %2491 }
0x10b8   :  { %v1691_v24 = vmul.f32 %v2492_v22, %v1675_v63  ;;  %v1710_v27 = vadd.f32 %v2077_v25, %v1700_v23 }
0x10ba   :  { %v1701_v26 = vmul.f32 %v2075_v21, %v1691_v24  ;;  %v2108_v24 = vld [vmem:[#allocation2] ss:$0 sm:$0xff] }
0x10bc   :  { %v1711_v28 = vadd.f32 %v2077_v25, %v1701_v26 }
0x10be   :  { %v1712_v29 = vpack.c.bf16 %v1711_v28, %v1710_v27 }
0x10c0   :  { %2325 = vmatmul.mubr.msk.bf16.vlgmr.msra.gmra.mrb[44].mxu1 %vm100_vm1, %v1712_v29 }
0x10c1   :  { %2344 = vmatprep.mubr.msk.f32.mxu1 %vm2498_vm0, %v2497_v0  ;;  %v2096_v0 = vld [vmem:[%s3060_s13 + $0x1] ss:$0 sm:$0xff] }
0x1193   :  { %v1775_v35 = vpop.f32.mrb[44].mxu1 }
0x1194   :  { %v1776_v36 = vadd.f32 %v2083_v33, %v1775_v35  ;;  %v2326_v37 = vpop.f32.mrb[45].mxu1 }
0x1195   :  { %v1778_v38 = vpop.f32.mrb[46].mxu1 }
0x1196   :  { %v1779_v40 = vadd.f32 %v2083_v33, %v1778_v38  ;;  %v2327_v41 = vpop.f32.mrb[47].mxu1  ;;  %v1782_v42 = vmax.f32 %v1776_v36, 0.0 }
0x1198   :  { %v1783_v7 = vmax.f32 %v1779_v40, 0.0 }
0x119a   :  { %v1784_v8 = vpack.c.bf16 %v1783_v7, %v1782_v42 }
0x119c   :  { %2337 = vmatmul.mubr.msk.bf16.vlgmr.msra.gmra.mrb[44].mxu0 %vm903_vm5, %v1784_v8 }
0x126f   :  { %v1863_v43 = vpop.f32.mrb[44].mxu0 }
0x1270   :  { %v1864_v44 = vadd.f32 %v2096_v0, %v1863_v43  ;;  %v2338_v46 = vpop.f32.mrb[45].mxu0 }
0x1271   :  { %v1866_v47 = vpop.f32.mrb[46].mxu0 }
0x1272   :  { %v1867_v48 = vadd.f32 %v2096_v0, %v1866_v47  ;;  %v2339_v30 = vpop.f32.mrb[47].mxu0  ;;  %v1870_v49 = vadd.f32 %v1864_v44, %v1710_v27 }
0x1274   :  { %v1872_v50 = vsel %vm100_vm1, %v1870_v49, 0.0  ;;  %v1871_v34 = vadd.f32 %v1867_v48, %v1711_v28 }
0x1275   :  { %1873 = vadd.xlane.f32.xlu1 %v1872_v50 }
0x1276   :  { %v1875_v45 = vsel %vm100_vm1, %v1871_v34, 0.0 }
0x1277   :  { %1876 = vadd.xlane.f32.xlu0 %v1875_v45 }
0x1302   :  { %v1874_v52 = vpop.xlane.xlu1 %1873 }
0x1303   :  { %v1878_v53 = vmul.f32 0.03125, %v1874_v52 }
0x1304   :  { %v1877_v39 = vpop.xlane.xlu0 %1876 }
0x1305   :  { %v1880_v54 = vsub.f32 %v1870_v49, %v1878_v53  ;;  %v1879_v55 = vmul.f32 0.03125, %v1877_v39 }
0x1307   :  { %v1881_v11 = vsub.f32 %v1871_v34, %v1879_v55  ;;  %v1882_v57 = vmul.f32 %v1880_v54, %v1880_v54 }
0x1309   :  { %v1884_v58 = vsel %vm100_vm1, %v1882_v57, 0.0  ;;  %v1883_v59 = vmul.f32 %v1881_v11, %v1881_v11 }
0x130a   :  { %1885 = vadd.xlane.f32.xlu1 %v1884_v58 }
0x130b   :  { %v1887_v62 = vsel %vm100_vm1, %v1883_v59, 0.0 }
0x130c   :  { %1888 = vadd.xlane.f32.xlu0 %v1887_v62 }
0x1397   :  { %v1886_v2 = vpop.xlane.xlu1 %1885 }
0x1398   :  { %v1890_v51 = vmul.f32 0.03125, %v1886_v2 }
0x1399   :  { %v1889_v56 = vpop.xlane.xlu0 %1888 }
0x139a   :  { %v1892_v3 = vadd.f32 1e-05, %v1890_v51  ;;  %v1891_v63 = vmul.f32 0.03125, %v1889_v56 }
0x139c   :  { %2493 = vrsqrt.f32 %v1892_v3  ;;  %v1893_v4 = vadd.f32 1e-05, %v1891_v63 }
0x139e   :  { %2495 = vrsqrt.f32 %v1893_v4 }
0x13a6   :  { %v2494_v5 = vpop.eup %2493 }
0x13a7   :  { %v1896_v60 = vmul.f32 %v2494_v5, %v1880_v54 }
0x13a8   :  { %v2496_v61 = vpop.eup %2495 }
0x13a9   :  { %v1897_v9 = vmul.f32 %v2496_v61, %v1881_v11  ;;  %v1906_v10 = vmul.f32 %v2103_v6, %v1896_v60 }
0x13ab   :  { %v1907_v13 = vmul.f32 %v2103_v6, %v1897_v9  ;;  %v1916_v14 = vadd.f32 %v2105_v12, %v1906_v10 }
0x13ad   :  { %v1917_v15 = vadd.f32 %v2105_v12, %v1907_v13 }
0x13af   :  { %v2348_v16 = vpack.c.bf16 %v1917_v15, %v1916_v14 }
0x13b1   :  { %2349 = vmatpush3.bf16.msra.mxu1 %v2348_v16 }
0x13b4   :  { %2345 = vmatmul.mubr.msk.f32.vlgmr.msra.gmra.mrb[48].mxu1 %vm366_vm3, %v1918_v18 }
0x1487   :  { %v1988_v20 = vpop.f32.mrb[48].mxu1 }
0x1488   :  { %v1999_v21 = vmul.f32 %v2107_v19, %v1988_v20  ;;  %v2346_v22 = vpop.f32.mrb[49].mxu1 }
0x148a   :  { %v2001_v23 = vsel %vm2000_vm6, %v1999_v21, 0.0 }
0x148b   :  { %2002 = vadd.xlane.f32.xlu1 %v2001_v23 }
0x1518   :  { %v2003_v25 = vpop.xlane.xlu1 %2002 }
0x1519   :  { %v2011_v26 = vadd.f32 %v2108_v24, %v2003_v25 }
0x151b   :  { %2013 = vst.msk [vmem:[%s3066_s18] sm:$0x3] %vm2012_vm7, %v2011_v26 }

</bundles_post_ra>
